<compile_context>
chip_gen: v7x
topology: tpu7x:2x2x1
jax: 0.10.0
libtpu: 0.0.40
codegen_flags: <defaults>
</compile_context>

<pallas_src>
import jax
import jax.numpy as jnp
import numpy as np
from jax.experimental import pallas as pl
from jax.experimental.pallas import tpu as pltpu

# ---------------- problem configuration (mirrors MixedBlock.__init__ arguments) --------------
NUM_MB = 4              # MixedBlocks batched into ONE pallas_call (grid axis)
NUM_PREV = 3            # number of previous nodes fed into each mixed block
NUM_INPUTS = 2          # self._num_inputs
NUM_BLOCK_TYPES = 3     # len(block_keys)
B = 128                 # batch rows per tile (review: 128-256 rows per dot)
D = 128                 # hidden / embedding dim
NODE2TYPE = ["vector", "matrix", "vector"]   # self._node2type (metadata only)
NUM_WEIGHTS = NUM_PREV * NUM_INPUTS + NUM_BLOCK_TYPES


def _activation(bidx, h, x1, x2):
    """Synthetic candidate blocks standing in for the external BLOCKS registry."""
    if bidx == 0:            # candidate block 0: MLP (linear + ReLU)
        return jnp.maximum(h, 0.0)
    elif bidx == 1:          # candidate block 1: plain linear
        return h
    else:                    # candidate block 2: sigmoid gate over the summed inputs
        return jax.nn.sigmoid(h) * (x1 + x2)


# ---------------- dense (relaxed / training weights) kernel ----------------------------------
def mixed_block_dense_kernel(w_ref, nodes_ref, wp_ref, bp_ref, out_ref):
    """One grid step = one MixedBlock, all candidate blocks fused in a single K=256 matmul.

    w_ref     : (NUM_MB, NUM_WEIGHTS) f32, SMEM (scalar prefetch)  — architecture weights
    nodes_ref : (NUM_PREV, B, D) f32, VMEM                          — shared previous nodes
    wp_ref    : (1, 2D, NBLK*D) bf16, VMEM                          — this MB's packed [W1;W2]
    bp_ref    : (1, 1, NBLK*D) f32, VMEM                            — this MB's packed bias
    out_ref   : (1, B, D) f32
    """
    mb = pl.program_id(0)

    # x = sum_i ( w_i * node_i if w_i > 0 else w_i )  — scalar scale/shift, no full broadcasts
    def mix(offset):
        acc = jnp.zeros((B, D), jnp.float32)
        for i in range(NUM_PREV):
            wi = w_ref[mb, offset + i]
            scale = jnp.where(wi > 0, wi, 0.0)
            shift = jnp.where(wi > 0, 0.0, wi)
            acc = acc + scale * nodes_ref[i] + shift
        return acc

    x1 = mix(0)
    x2 = mix(NUM_PREV) if NUM_INPUTS == 2 else x1

    # cast BEFORE concat (halves the pre-matmul temp), single fused (B,2D)@(2D,3D) MXU pass
    x_cat = jnp.concatenate([x1.astype(jnp.bfloat16), x2.astype(jnp.bfloat16)], axis=1)
    h_all = jnp.dot(x_cat, wp_ref[0], preferred_element_type=jnp.float32) + bp_ref[0]

    # out = sum_b ( w_b * blk_b(x1, x2) if w_b > 0 else w_b )
    out = jnp.zeros((B, D), jnp.float32)
    for bidx in range(NUM_BLOCK_TYPES):
        h = h_all[:, bidx * D:(bidx + 1) * D]
        y = _activation(bidx, h, x1, x2)
        wb = w_ref[mb, NUM_PREV * NUM_INPUTS + bidx]
        scale = jnp.where(wb > 0, wb, 0.0)
        shift = jnp.where(wb > 0, 0.0, wb)
        out = out + scale * y + shift

    out_ref[0] = out


# ---------------- one-hot (NAS-eval) kernel ---------------------------------------------------
def mixed_block_onehot_kernel(sel_ref, n1_ref, n2_ref, wp_ref, bp_ref, out_ref):
    """One-hot fast path: scalar-prefetch `sel` drives the index_maps, so only the two selected
    node tiles and the selected block's (2D, D) weight slab are DMA'd.

    sel_ref : (NUM_MB, 3) int32, SMEM  — [chosen_node1, chosen_node2, chosen_block]
    n1_ref  : (1, B, D) f32            — nodes[sel[mb,0]]
    n2_ref  : (1, B, D) f32            — nodes[sel[mb,1]]
    wp_ref  : (1, 2D, D) bf16          — packed weight slab of the chosen block
    bp_ref  : (1, 1, D) f32            — bias slab of the chosen block
    out_ref : (1, B, D) f32
    """
    mb = pl.program_id(0)
    x1 = n1_ref[0]
    x2 = n2_ref[0]
    x_cat = jnp.concatenate([x1.astype(jnp.bfloat16), x2.astype(jnp.bfloat16)], axis=1)
    h = jnp.dot(x_cat, wp_ref[0], preferred_element_type=jnp.float32) + bp_ref[0]

    blk = sel_ref[mb, 2]

    @pl.when(blk == 0)
    def _():
        out_ref[0] = jnp.maximum(h, 0.0)

    @pl.when(blk == 1)
    def _():
        out_ref[0] = h

    @pl.when(blk == 2)
    def _():
        out_ref[0] = jax.nn.sigmoid(h) * (x1 + x2)


# ---------------- pallas_call wrappers --------------------------------------------------------
@jax.jit
def mixed_blocks_train_pallas(arch_weights, nodes, wp, bp):
    """Relaxed / continuous architecture weights — no host readback anywhere on this path."""
    return pl.pallas_call(
        mixed_block_dense_kernel,
        out_shape=jax.ShapeDtypeStruct((NUM_MB, B, D), jnp.float32),
        grid_spec=pltpu.PrefetchScalarGridSpec(
            num_scalar_prefetch=1,                      # arch weights -> SMEM
            grid=(NUM_MB,),
            in_specs=[
                pl.BlockSpec((NUM_PREV, B, D), lambda i, w: (0, 0, 0)),                  # nodes (resident)
                pl.BlockSpec((1, 2 * D, NUM_BLOCK_TYPES * D), lambda i, w: (i, 0, 0)),   # packed W
                pl.BlockSpec((1, 1, NUM_BLOCK_TYPES * D), lambda i, w: (i, 0, 0)),       # packed bias
            ],
            out_specs=pl.BlockSpec((1, B, D), lambda i, w: (i, 0, 0)),
        ),
        compiler_params=pltpu.CompilerParams(dimension_semantics=("parallel",)),
    )(arch_weights, nodes, wp, bp)


@jax.jit
def mixed_blocks_eval_pallas(sel, nodes, wp, bp):
    """One-hot architecture (eval) — node/weight slabs chosen by scalar-prefetch index_maps."""
    return pl.pallas_call(
        mixed_block_onehot_kernel,
        out_shape=jax.ShapeDtypeStruct((NUM_MB, B, D), jnp.float32),
        grid_spec=pltpu.PrefetchScalarGridSpec(
            num_scalar_prefetch=1,                      # sel -> SMEM, used inside index_maps
            grid=(NUM_MB,),
            in_specs=[
                pl.BlockSpec((1, B, D), lambda i, s: (s[i, 0], 0, 0)),       # chosen node 1
                pl.BlockSpec((1, B, D), lambda i, s: (s[i, 1], 0, 0)),       # chosen node 2
                pl.BlockSpec((1, 2 * D, D), lambda i, s: (i, 0, s[i, 2])),   # chosen W slab
                pl.BlockSpec((1, 1, D), lambda i, s: (i, 0, s[i, 2])),       # chosen bias slab
            ],
            out_specs=pl.BlockSpec((1, B, D), lambda i, s: (i, 0, 0)),
        ),
        compiler_params=pltpu.CompilerParams(dimension_semantics=("parallel",)),
    )(sel, nodes, nodes, wp, bp)


# ---------------- host-side packing of the (static) candidate-block params -------------------
def pack_block_params(W1, W2, bias):
    """W1,W2: (NUM_MB, NBLK, D, D); bias: (NUM_MB, NBLK, 1, D)
       -> wp (NUM_MB, 2D, NBLK*D) bf16, bp (NUM_MB, 1, NBLK*D) f32."""
    top = jnp.concatenate([W1[:, b] for b in range(NUM_BLOCK_TYPES)], axis=2)   # (MB, D, 3D)
    bot = jnp.concatenate([W2[:, b] for b in range(NUM_BLOCK_TYPES)], axis=2)   # (MB, D, 3D)
    wp = jnp.concatenate([top, bot], axis=1).astype(jnp.bfloat16)               # (MB, 2D, 3D)
    bp = jnp.concatenate([bias[:, b] for b in range(NUM_BLOCK_TYPES)], axis=2).astype(jnp.float32)
    return wp, bp


# ---------------- eval-time-only one-hot decode (no per-step host sync on training path) -----
def _segment_is_one_hot(seg):
    return sum(1 for v in seg if v == 1.0) == 1 and all(v in (0.0, 1.0) for v in seg)


def decode_onehot_architecture(arch_weights_np):
    """Host-side equivalent of weights.data.cpu().tolist().index(1), run ONCE at eval time.
    Returns (NUM_MB, 3) int32 [node1, node2, block] or None if any segment is not one-hot
    (relaxed / training weights -> dense kernel).  Exact 0.0/1.0 equality is intentional."""
    arch_weights_np = np.asarray(arch_weights_np)
    sel = np.zeros((arch_weights_np.shape[0], 3), np.int32)
    for mb in range(arch_weights_np.shape[0]):
        wl = arch_weights_np[mb].tolist()
        seg1 = wl[:NUM_PREV]
        seg2 = wl[NUM_PREV:NUM_PREV * NUM_INPUTS]
        segb = wl[NUM_PREV * NUM_INPUTS:]
        if not (_segment_is_one_hot(seg1) and _segment_is_one_hot(seg2)
                and _segment_is_one_hot(segb)):
            return None
        n1 = seg1.index(1.0)
        n2 = seg2.index(1.0) if NUM_INPUTS == 2 else n1
        _ = NODE2TYPE[n1], NODE2TYPE[n2]   # node_type metadata (external BLOCKS reshape only)
        sel[mb] = [n1, n2, segb.index(1.0)]
    return sel


# ---------------- optional input-noise branch (block_id >= 2 and std_lambda > 0) -------------
def apply_input_noise(nodes, num_init_node, std_lambda, key):
    noisy = []
    for i in range(nodes.shape[0]):
        node = nodes[i]
        if i < num_init_node:
            std = std_lambda * jnp.std(node, ddof=1)   # torch.std is unbiased
            key, sub = jax.random.split(key)
            node = node + std * jax.random.normal(sub, node.shape, node.dtype)
        noisy.append(node)
    return jnp.stack(noisy)


# ---------------- forward glue (faithful to MixedBlock.forward control flow) -----------------
def mixed_blocks_forward(nodes, arch_weights, packed_params, *, arch_sel=None,
                         block_id=0, num_init_node=1, std_lambda=0.0, noise_key=None):
    """nodes: (NUM_PREV, B, D); arch_weights: (NUM_MB, NUM_WEIGHTS); arch_sel: optional
    precomputed eval-time one-hot descriptor.  The training path (arch_sel=None) performs
    no device->host readback."""
    wp, bp = packed_params
    nodes = jnp.asarray(nodes, jnp.float32)
    if block_id >= 2 and std_lambda > 0:
        nodes = apply_input_noise(nodes, num_init_node, std_lambda, noise_key)
    if arch_sel is not None:
        return mixed_blocks_eval_pallas(jnp.asarray(arch_sel, jnp.int32), nodes, wp, bp)
    return mixed_blocks_train_pallas(jnp.asarray(arch_weights, jnp.float32), nodes, wp, bp)


# ---------------- pure-JAX reference (same bf16-at-the-dot math) ------------------------------
def mixed_blocks_reference(nodes, arch_weights, packed_params):
    wp, bp = packed_params
    nodes = jnp.asarray(nodes, jnp.float32)
    arch_weights = jnp.asarray(arch_weights, jnp.float32)
    outs = []
    for mb in range(arch_weights.shape[0]):
        w = arch_weights[mb]

        def mix(off):
            acc = jnp.zeros((B, D), jnp.float32)
            for i in range(NUM_PREV):
                wi = w[off + i]
                acc = acc + jnp.where(wi > 0, wi * nodes[i], wi)
            return acc

        x1 = mix(0)
        x2 = mix(NUM_PREV)
        x_cat = jnp.concatenate([x1.astype(jnp.bfloat16), x2.astype(jnp.bfloat16)], axis=1)
        h_all = jnp.dot(x_cat, wp[mb], preferred_element_type=jnp.float32) + bp[mb]
        out = jnp.zeros((B, D), jnp.float32)
        for bidx in range(NUM_BLOCK_TYPES):
            h = h_all[:, bidx * D:(bidx + 1) * D]
            y = _activation(bidx, h, x1, x2)
            wb = w[NUM_PREV * NUM_INPUTS + bidx]
            out = out + jnp.where(wb > 0, wb * y, wb)
        outs.append(out)
    return jnp.stack(outs)


# ---------------- main -------------------------------------------------------------------------
if __name__ == "__main__":
    key = jax.random.PRNGKey(0)
    k_nodes, k_w1, k_w2, k_b = jax.random.split(key, 4)

    # shared previous nodes: (NUM_PREV, B, D)
    nodes = jax.random.normal(k_nodes, (NUM_PREV, B, D), jnp.float32)

    # per-MixedBlock candidate-block parameters (packed once host-side; they are static)
    W1 = jax.random.normal(k_w1, (NUM_MB, NUM_BLOCK_TYPES, D, D), jnp.float32) / np.sqrt(D)
    W2 = jax.random.normal(k_w2, (NUM_MB, NUM_BLOCK_TYPES, D, D), jnp.float32) / np.sqrt(D)
    bias = jax.random.normal(k_b, (NUM_MB, NUM_BLOCK_TYPES, 1, D), jnp.float32) * 0.01
    packed = pack_block_params(W1, W2, bias)

    # --- test 1: one-hot architecture weights -> scalar-prefetch-gather eval kernel ---------
    choices = [(0, 1, 0), (1, 2, 1), (2, 0, 2), (0, 2, 2)]   # (node1, node2, block) per MB
    w_onehot = np.zeros((NUM_MB, NUM_WEIGHTS), np.float32)
    for mb, (n1, n2, blk) in enumerate(choices):
        w_onehot[mb, n1] = 1.0
        w_onehot[mb, NUM_PREV + n2] = 1.0
        w_onehot[mb, NUM_PREV * NUM_INPUTS + blk] = 1.0
    sel = decode_onehot_architecture(w_onehot)               # eval-time-only host decode
    assert sel is not None

    out1 = jax.block_until_ready(
        mixed_blocks_forward(nodes, jnp.asarray(w_onehot), packed, arch_sel=sel,
                             block_id=1, num_init_node=1, std_lambda=0.0))
    ref1 = mixed_blocks_reference(nodes, w_onehot, packed)
    np.testing.assert_allclose(np.asarray(out1), np.asarray(ref1), rtol=5e-3, atol=5e-3)

    # --- test 2: relaxed (training) weights -> dense fused kernel, NO host readback ---------
    #             exercises the `else w` (zero / negative weight) branches
    w_dense = np.array([[0.50, 1.00, -0.25, 1.00, 0.00, 0.75, 0.60, -0.10, 0.80],
                        [0.20, -0.40, 0.90, 0.10, 0.70, -0.30, -0.20, 0.50, 0.40],
                        [1.00, 0.00, 0.00, -0.50, 0.30, 0.60, 0.90, 0.05, -0.70],
                        [0.33, 0.33, 0.34, 0.25, 0.25, 0.50, 0.10, 0.80, 0.10]],
                       np.float32)

    out2 = jax.block_until_ready(
        mixed_blocks_forward(nodes, jnp.asarray(w_dense), packed,
                             block_id=1, num_init_node=1, std_lambda=0.0))
    ref2 = mixed_blocks_reference(nodes, w_dense, packed)
    np.testing.assert_allclose(np.asarray(out2), np.asarray(ref2), rtol=5e-3, atol=5e-3)

    print("KERNEL_OK")
</pallas_src>

<mosaic_0001>
module attributes {stable_mosaic.version = 11 : i64} {
  func.func @mixed_block_onehot_kernel(%arg0: i32, %arg1: memref<4x3xi32, #tpu.memory_space<smem>>, %arg2: memref<1x128x128xf32, #tpu.memory_space<vmem>>, %arg3: memref<1x128x128xf32, #tpu.memory_space<vmem>>, %arg4: memref<1x256x128xbf16, #tpu.memory_space<vmem>>, %arg5: memref<1x1x128xf32, #tpu.memory_space<vmem>>, %arg6: memref<1x128x128xf32, #tpu.memory_space<vmem>>) attributes {dimension_semantics = [#tpu.dimension_semantics<parallel>], iteration_bounds = array<i64: 4>, scalar_prefetch = 1 : i64, scratch_operands = 0 : i64, tpu.core_type = #tpu.core_type<tc>, window_params = [{transform_indices = @transform_0, window_bounds = array<i64: 1, 128, 128>}, {transform_indices = @transform_1, window_bounds = array<i64: 1, 128, 128>}, {transform_indices = @transform_2, window_bounds = array<i64: 1, 256, 128>}, {transform_indices = @transform_3, window_bounds = array<i64: 1, 1, 128>}, {transform_indices = @transform_4, window_bounds = array<i64: 1, 128, 128>}]} {
    %c0 = arith.constant 0 : index
    %c0_0 = arith.constant 0 : index
    %c0_1 = arith.constant 0 : index
    %0 = vector.load %arg2[%c0, %c0_0, %c0_1] : memref<1x128x128xf32, #tpu.memory_space<vmem>>, vector<1x128x128xf32>
    %1 = vector.shape_cast %0 : vector<1x128x128xf32> to vector<128x128xf32>
    %c0_2 = arith.constant 0 : index
    %c0_3 = arith.constant 0 : index
    %c0_4 = arith.constant 0 : index
    %2 = vector.load %arg3[%c0_2, %c0_3, %c0_4] : memref<1x128x128xf32, #tpu.memory_space<vmem>>, vector<1x128x128xf32>
    %3 = vector.shape_cast %2 : vector<1x128x128xf32> to vector<128x128xf32>
    %4 = arith.truncf %1 : vector<128x128xf32> to vector<128x128xbf16>
    %5 = arith.truncf %3 : vector<128x128xf32> to vector<128x128xbf16>
    %6 = tpu.concatenate %4, %5 in 1 : vector<128x128xbf16>, vector<128x128xbf16> -> vector<128x256xbf16>
    %c0_5 = arith.constant 0 : index
    %c0_6 = arith.constant 0 : index
    %c0_7 = arith.constant 0 : index
    %7 = vector.load %arg4[%c0_5, %c0_6, %c0_7] : memref<1x256x128xbf16, #tpu.memory_space<vmem>>, vector<1x256x128xbf16>
    %8 = vector.shape_cast %7 : vector<1x256x128xbf16> to vector<256x128xbf16>
    %cst = arith.constant dense<0.000000e+00> : vector<128x128xf32>
    %9 = tpu.matmul %6, %8, %cst {dimension_numbers = #tpu.dot_dimension_numbers<[1], [0], [0], [1], [0, 0, 1, 1], [], []>} : vector<128x256xbf16>, vector<256x128xbf16>, vector<128x128xf32> -> vector<128x128xf32>
    %c0_8 = arith.constant 0 : index
    %c0_9 = arith.constant 0 : index
    %c0_10 = arith.constant 0 : index
    %10 = vector.load %arg5[%c0_8, %c0_9, %c0_10] : memref<1x1x128xf32, #tpu.memory_space<vmem>>, vector<1x1x128xf32>
    %11 = vector.shape_cast %10 : vector<1x1x128xf32> to vector<1x128xf32>
    %12 = vector.broadcast %11 : vector<1x128xf32> to vector<128x128xf32>
    %13 = arith.addf %9, %12 : vector<128x128xf32>
    %14 = arith.index_cast %arg0 : i32 to index
    %c2 = arith.constant 2 : index
    %15 = memref.load %arg1[%14, %c2] : memref<4x3xi32, #tpu.memory_space<smem>>
    %c0_i32 = arith.constant 0 : i32
    %16 = arith.cmpi eq, %15, %c0_i32 : i32
    %17 = arith.extui %16 : i1 to i32
    %c0_i32_11 = arith.constant 0 : i32
    %18 = arith.cmpi ne, %17, %c0_i32_11 : i32
    scf.if %18 {
      %cst_14 = arith.constant 0.000000e+00 : f32
      %25 = vector.broadcast %cst_14 : f32 to vector<128x128xf32>
      %26 = arith.maximumf %13, %25 : vector<128x128xf32>
      %c0_15 = arith.constant 0 : index
      %c0_16 = arith.constant 0 : index
      %c0_17 = arith.constant 0 : index
      %27 = vector.load %arg6[%c0_15, %c0_16, %c0_17] : memref<1x128x128xf32, #tpu.memory_space<vmem>>, vector<1x128x128xf32>
      %28 = vector.shape_cast %27 : vector<1x128x128xf32> to vector<128x128xf32>
      %29 = vector.shape_cast %26 : vector<128x128xf32> to vector<1x128x128xf32>
      tpu.vector_store %arg6[%c0_15, %c0_16, %c0_17], %29 {strides = array<i32>} : memref<1x128x128xf32, #tpu.memory_space<vmem>>, vector<1x128x128xf32>,
    } else {
    }
    %c1_i32 = arith.constant 1 : i32
    %19 = arith.cmpi eq, %15, %c1_i32 : i32
    %20 = arith.extui %19 : i1 to i32
    %c0_i32_12 = arith.constant 0 : i32
    %21 = arith.cmpi ne, %20, %c0_i32_12 : i32
    scf.if %21 {
      %c0_14 = arith.constant 0 : index
      %c0_15 = arith.constant 0 : index
      %c0_16 = arith.constant 0 : index
      %25 = vector.load %arg6[%c0_14, %c0_15, %c0_16] : memref<1x128x128xf32, #tpu.memory_space<vmem>>, vector<1x128x128xf32>
      %26 = vector.shape_cast %25 : vector<1x128x128xf32> to vector<128x128xf32>
      %27 = vector.shape_cast %13 : vector<128x128xf32> to vector<1x128x128xf32>
      tpu.vector_store %arg6[%c0_14, %c0_15, %c0_16], %27 {strides = array<i32>} : memref<1x128x128xf32, #tpu.memory_space<vmem>>, vector<1x128x128xf32>,
    } else {
    }
    %c2_i32 = arith.constant 2 : i32
    %22 = arith.cmpi eq, %15, %c2_i32 : i32
    %23 = arith.extui %22 : i1 to i32
    %c0_i32_13 = arith.constant 0 : i32
    %24 = arith.cmpi ne, %23, %c0_i32_13 : i32
    scf.if %24 {
      %25 = arith.negf %13 : vector<128x128xf32>
      %26 = math.exp %25 : vector<128x128xf32>
      %cst_14 = arith.constant 1.000000e+00 : f32
      %27 = vector.broadcast %cst_14 : f32 to vector<128x128xf32>
      %28 = arith.addf %27, %26 : vector<128x128xf32>
      %29 = arith.divf %27, %28 : vector<128x128xf32>
      %30 = arith.addf %1, %3 : vector<128x128xf32>
      %31 = arith.mulf %29, %30 : vector<128x128xf32>
      %c0_15 = arith.constant 0 : index
      %c0_16 = arith.constant 0 : index
      %c0_17 = arith.constant 0 : index
      %32 = vector.load %arg6[%c0_15, %c0_16, %c0_17] : memref<1x128x128xf32, #tpu.memory_space<vmem>>, vector<1x128x128xf32>
      %33 = vector.shape_cast %32 : vector<1x128x128xf32> to vector<128x128xf32>
      %34 = vector.shape_cast %31 : vector<128x128xf32> to vector<1x128x128xf32>
      tpu.vector_store %arg6[%c0_15, %c0_16, %c0_17], %34 {strides = array<i32>} : memref<1x128x128xf32, #tpu.memory_space<vmem>>, vector<1x128x128xf32>,
    } else {
    }
    return
  }
  func.func @transform_0(%arg0: i32, %arg1: memref<4x3xi32, #tpu.memory_space<smem>>) -> (i32, i32, i32) {
    %0 = arith.index_cast %arg0 : i32 to index
    %c0 = arith.constant 0 : index
    %1 = memref.load %arg1[%0, %c0] : memref<4x3xi32, #tpu.memory_space<smem>>
    %c0_i32 = arith.constant 0 : i32
    %c0_i32_0 = arith.constant 0 : i32
    %c0_i32_1 = arith.constant 0 : i32
    return %1, %c0_i32, %c0_i32_0 : i32, i32, i32
  }
  func.func @transform_1(%arg0: i32, %arg1: memref<4x3xi32, #tpu.memory_space<smem>>) -> (i32, i32, i32) {
    %0 = arith.index_cast %arg0 : i32 to index
    %c1 = arith.constant 1 : index
    %1 = memref.load %arg1[%0, %c1] : memref<4x3xi32, #tpu.memory_space<smem>>
    %c0_i32 = arith.constant 0 : i32
    %c0_i32_0 = arith.constant 0 : i32
    %c0_i32_1 = arith.constant 0 : i32
    return %1, %c0_i32, %c0_i32_0 : i32, i32, i32
  }
  func.func @transform_2(%arg0: i32, %arg1: memref<4x3xi32, #tpu.memory_space<smem>>) -> (i32, i32, i32) {
    %0 = arith.index_cast %arg0 : i32 to index
    %c2 = arith.constant 2 : index
    %1 = memref.load %arg1[%0, %c2] : memref<4x3xi32, #tpu.memory_space<smem>>
    %c0_i32 = arith.constant 0 : i32
    %c0_i32_0 = arith.constant 0 : i32
    return %arg0, %c0_i32, %1 : i32, i32, i32
  }
  func.func @transform_3(%arg0: i32, %arg1: memref<4x3xi32, #tpu.memory_space<smem>>) -> (i32, i32, i32) {
    %0 = arith.index_cast %arg0 : i32 to index
    %c2 = arith.constant 2 : index
    %1 = memref.load %arg1[%0, %c2] : memref<4x3xi32, #tpu.memory_space<smem>>
    %c0_i32 = arith.constant 0 : i32
    %c0_i32_0 = arith.constant 0 : i32
    return %arg0, %c0_i32, %1 : i32, i32, i32
  }
  func.func @transform_4(%arg0: i32, %arg1: memref<4x3xi32, #tpu.memory_space<smem>>) -> (i32, i32, i32) {
    %c0_i32 = arith.constant 0 : i32
    %c0_i32_0 = arith.constant 0 : i32
    %c0_i32_1 = arith.constant 0 : i32
    return %arg0, %c0_i32, %c0_i32_0 : i32, i32, i32
  }
}

</mosaic_0001>

<bundles_post_ra>
// kernel: mixed_blocks_eval_pallas.1
= control target key start
LH: loop header
LB: loop body
LE: loop exit
PB: predicated region body
PF: predicated region fallthrough
CT: control target
= control target key end

     0   :  { %s2688_s0 = inlined_call_operand.hbm [shape: s32[4,3], index: 0, kind: input, shape index: {}]   ;;  %s2689_s1 = inlined_call_operand.hbm [shape: f32[3,128,128], index: 1, kind: input, shape index: {}, may-alias: {1,2}]   ;;  %s2690_s2 = inlined_call_operand.hbm [shape: f32[3,128,128], index: 2, kind: input, shape index: {}, may-alias: {1,2}]   ;;  %s2691_s3 = inlined_call_operand.hbm [shape: bf16[4,256,384], index: 3, kind: input, shape index: {}]   ;;  %s2692_s4 = inlined_call_operand.hbm [shape: f32[4,1,384], index: 4, kind: input, shape index: {}]   ;;  %s2693_s5 = inlined_call_operand.hbm [shape: f32[4,128,128], index: 5, kind: output, shape index: {}]  }
   0x1   :  { %2714 = sst [smem:[#allocation39_spill]] %s2689_s1  ;;  %s1450_s20 = scalar_lea.hbm %s2688_s0, 64 }
   0x2   :  { %2715 = sst [smem:[#allocation40_spill]] %s2690_s2  ;;  %p1451_p0 = scmp.ne.s32.totalorder %s2688_s0, %s1450_s20 }
   0x3   :  { %2716 = sst [smem:[#allocation41_spill]] %s2691_s3  ;;  %p1454_p1 = scmp.lt.u32.totalorder %s1450_s20, %s2688_s0 }
   0x4   :  { %2717 = sst [smem:[#allocation42_spill]] %s2692_s4 }
   0x5   :  { %2718 = sst [smem:[#allocation43_spill]] %s2693_s5  ;;  %p1456_p2 = pnand %p1454_p1, %p1451_p0 }
   0x7   :  { %1459 = shalt.err (!%p1456_p2)  }
   0x8   :  { %s1758_s25 = smov [#allocation3]  }
   0x9   :  { %11 = dma.hbm_to_smem %s2688_s0, 64, %s1758_s25, [#allocation2] }
   0xa   :  { %1672 = dma.done.wait [#allocation2], 64 }
   0xb   :  { %1673 = vsyncadd [#allocation2], 4294967232 }
   0xc   :  { %13 = sfence }
   0xd   :  { %14 = vsyncpa [#allocation5], 0 }
   0xe   :  { %16 = vsyncpa [#allocation5 + $0x1], 0 }
   0xf   :  { %17 = vsyncpa [#allocation8], 0 }
  0x10   :  { %19 = vsyncpa [#allocation8 + $0x1], 0 }
  0x11   :  { %20 = vsyncpa [#allocation11], 0 }
  0x12   :  { %22 = vsyncpa [#allocation11 + $0x1], 0 }
  0x13   :  { %23 = vsyncpa [#allocation6], 0 }
  0x14   :  { %25 = vsyncpa [#allocation6 + $0x1], 0  ;;  %s1813_s28 = smov 0   ;;  %s1815_s29 = smov 0  }
  0x15   :  { %s1817_s30 = smov 0   ;;  %s1819_s6 = smov 0  }
  0x16   :  { %s1821_s0 = smov 0   ;;  %s1823_s7 = smov 0  }
  0x17   :  { %s1825_s8 = smov 0   ;;  %s1827_s9 = smov 0  }
  0x18   :  { %s1829_s10 = smov 0   ;;  %s1831_s11 = smov 0  }
  0x19   :  { %s1833_s12 = smov 0   ;;  %s1835_s13 = smov 0  }
  0x1a   :  { %s1837_s14 = smov 0   ;;  %s1839_s15 = smov 0  }
  0x1b   :  { %s1841_s16 = smov 0   ;;  %s1843_s17 = smov 0  }
  0x1c LB: > { %2719 = sst [smem:[#allocation27_spill]] %s1696_s28  ;;  %s1892_s18 = sadd.s32 4294967295, %s1756_s17   ;;  %s1756_s17 = sphi %s1843_s17, %s2810_s17   ;;  %s1752_s16 = sphi %s1841_s16, %s2797_s16   ;;  %s1748_s15 = sphi %s1839_s15, %s2809_s15   ;;  %s1744_s14 = sphi %s1837_s14, %s2808_s14   ;;  %s1740_s13 = sphi %s1835_s13, %s2795_s13   ;;  %s1736_s12 = sphi %s1833_s12, %s2794_s12   ;;  %s1732_s11 = sphi %s1831_s11, %s2807_s11   ;;  %s1728_s10 = sphi %s1829_s10, %s2806_s10   ;;  %s1724_s9 = sphi %s1827_s9, %s2805_s9   ;;  %s1720_s8 = sphi %s1825_s8, %s2804_s8   ;;  %s1716_s7 = sphi %s1823_s7, %s2803_s7   ;;  %s1712_s0 = sphi %s1821_s0, %s2802_s0   ;;  %s1708_s6 = sphi %s1819_s6, %s2791_s6   ;;  %s1704_s30 = sphi %s1817_s30, %s2801_s30   ;;  %s1700_s29 = sphi %s1815_s29, %s2789_s29   ;;  %s1696_s28 = sphi %s1813_s28, %s2799_s28  }
  0x1d   : > { %2720 = sst [smem:[#allocation28_spill]] %s1700_s29  ;;  %s1895_s19 = sshll.u32 %s1756_s17, 7 }
  0x1e   : > { %2721 = sst [smem:[#allocation29_spill]] %s1704_s30  ;;  %s1901_s21 = sadd.s32 128, %s1895_s19 }
  0x1f   : > { %2722 = sst [smem:[#allocation30_spill]] %s1708_s6  ;;  %p2706_p3 = scmp.eq.s32.totalorder %s1756_s17, 0 }
  0x20   : > { %2723 = sst [smem:[#allocation31_spill]] %s1712_s0  ;;  %p2705_p4 = scmp.eq.s32.totalorder %s1892_s18, 0 }
  0x21   : > { %2724 = sst [smem:[#allocation32_spill]] %s1736_s12  ;;  %s66_s22 = sadd.s32 1, %s1895_s19 }
  0x22   : > { %2725 = sst [smem:[#allocation33_spill]] %s1740_s13  ;;  %s69_s23 = sadd.s32 1, %s1901_s21 }
  0x23   : > { %2726 = sst [smem:[#allocation34_spill]] %s1752_s16  ;;  %s74_s26 = sadd.s32 1, %s1740_s13 }
  0x24   : > { %s1898_s20 = sld [smem:[#allocation3 + %s1895_s19]]  ;;  %p81_p5 = scmp.ne.s32.totalorder %s1740_s13, %s1736_s12 }
  0x25   : > { %s67_s24 = sld [smem:[#allocation3 + %s66_s22]]  ;;  %p87_p6 = scmp.ne.s32.totalorder %s1736_s12, %s1732_s11 }
  0x26   : > { %s70_s25 = sld [smem:[#allocation3 + %s69_s23]]  ;;  %s1912_s27 = sadd.s32 2, %s1895_s19 }
  0x27   : > { %p1916_p7 = por %p81_p5, %p2706_p3  ;;  %p1923_p9 = por %p87_p6, %p2705_p4 }
  0x28   : > { %p2704_p10 = scmp.lt.s32.totalorder %s1756_s17, 4  ;;  %s228_s12 = sand.u32 1, %s1756_s17  }
  0x29   : > { %s2728_s23 = scalar_select %p1923_p9, 1, 0 }
  0x2a   : > { %s230_s4 = sand.u32 1, %s1740_s13   ;;  %p1937_p12 = pnand %p2704_p10, %p1916_p7 }
  0x2b   : > { %2729 = sst [smem:[#allocation35_spill]] %s2728_s23  ;;  %s1040_s29 = sshll.u32 %s230_s4, 7 }
  0x2c   : > { %s71_s11 = ssub.s32 %s67_s24, %s70_s25  ;;  %p1049_p13 = scmp.ge.s32.totalorder %s1756_s17, 1 }
  0x2d   : > { %p72_p11 = scmp.eq.s32.totalorder %s71_s11, 0  ;;  %s2812_s22 = smov (!%p1916_p7, %s66_s22), 0 }
  0x2e   : > { %s1192_s24 = scalar_select %p1916_p7, [#allocation3], [#allocation14] }
  0x2f   : > { %s1931_s28 = scalar_select %p72_p11, %s1740_s13, %s74_s26  }
  0x30   : > { %s2814_s24 = smov (!%p2704_p10, %s1192_s24), [#allocation18]  ;;  %s2816_s22 = smov (!%p2704_p10, %s2812_s22), 0 }
  0x31   : > { %2730 = sst [smem:[#allocation36_spill]] %s1931_s28  ;;  %s232_s4 = scalar_lea.vmem [#allocation7], %s1040_s29 }
  0x32   : > { %s242_s25 = sshll.u32 %s232_s4, 4  ;;  %s235_s26 = sld [smem:[%s2814_s24 + %s2816_s22]]  ;;  %s1950_s25 = int_to_ptr.vmem [resolvable:$true] %s242_s25 }
  0x33   : > { %p297_p0 = scmp.lt.s32.totalorder %s1756_s17, 5  ;;  %s1958_s28 = sld [smem:[#allocation3 + %s1901_s21]] }
  0x34   : > { %s42_s5 = sadd.s32 1, %s1752_s16  ;;  %s2733_s2 = sld [smem:[#allocation40_spill]] }
  0x35   : > { %p1953_p1 = pnand %p1049_p13, %p297_p0  ;;  %s1970_s29 = scalar_lea.sflag [#allocation8], %s228_s12 }
  0x36   : > { %p1462_p7 = pneg %p1937_p12 }
  0x37   : > { %s2732_s11 = scalar_select %p1953_p1, 1, 0 }
  0x38   : > { %s1105_s13 = sshll.u32 %s235_s26, 11 }
  0x3a   : > { %s1966_s0 = scalar_lea.hbm %s2733_s2, %s1105_s13  ;;  %s1465_s6 = scalar_lea.hbm %s2733_s2, 6144 }
  0x3b   : > { %s1460_s22 = scalar_lea.hbm %s1966_s0, 2048  ;;  %p1466_p0 = scmp.lt.u32.totalorder %s1966_s0, %s2733_s2 }
  0x3c   : > { %p1461_p6 = scmp.ne.s32.totalorder %s1966_s0, %s1460_s22  ;;  %p1467_p8 = scmp.lt.u32.totalorder %s1465_s6, %s1460_s22 }
  0x3d   : > { %p1469_p4 = scmp.lt.u32.totalorder %s1460_s22, %s1966_s0 }
  0x3e   : > { %p1463_p11 = pnand %p1462_p7, %p1461_p6  ;;  %p1468_p10 = por %p1467_p8, %p1466_p0 }
  0x40   : > { %p1464_p13 = pneg %p1463_p11  ;;  %p1470_p5 = por %p1469_p4, %p1468_p10 }
  0x42   : > { %p1471_p3 = pnand %p1470_p5, %p1464_p13 }
  0x44   : > { %1474 = shalt.err (!%p1471_p3)
}
  0x45   : > { %s1475_s12 = scalar_lea.vmem %s1950_s25, 2048  ;;  %s1759_s26 = smov [#allocation7]  }
  0x46   : > { %p1476_p6 = scmp.ne.s32.totalorder %s1950_s25, %s1475_s12  ;;  %s1480_s24 = sshll.u32 %s1759_s26, 4  ;;  %s1481_s24 = int_to_ptr.vmem [resolvable:$false] %s1480_s24 }
  0x47   : > { %s1482_s4 = scalar_lea.vmem %s1481_s24, 4096  ;;  %p1483_p9 = scmp.lt.s32.totalorder %s1950_s25, %s1481_s24 }
  0x48   : > { %p1478_p11 = pnand %p1476_p6, %p1462_p7  ;;  %p1484_p8 = scmp.lt.s32.totalorder %s1482_s4, %s1475_s12 }
  0x4a   : > { %p1479_p2 = pneg %p1478_p11  ;;  %p1485_p0 = por %p1484_p8, %p1483_p9 }
  0x4c   : > { %p1486_p4 = pnand %p1485_p0, %p1479_p2 }
  0x4e   : > { %1489 = shalt.err (!%p1486_p4)
}
  0x4f   : > { %s2708_s22 = smov 128   ;;  %s2709_s6 = smov 8  }
  0x50   : > { %1217 = dma.hbm_to_vmem [thread:$0]  (!%p1937_p12), %s1966_s0, 2048, %s1950_s25, %s1970_s29, %s2708_s22, %s2708_s22, %s2709_s6  }
  0x51   : > { %p2734_p3 = scmp.ne.s32.totalorder %s1752_s16, %s1748_s15  ;;  %p2735_p9 = scmp.eq.s32.totalorder %s1756_s17, 0 }
  0x52   : > { %p2736_p2 = scmp.ne.s32.totalorder %s1748_s15, %s1744_s14  ;;  %p2737_p5 = scmp.eq.s32.totalorder %s1892_s18, 0 }
  0x53   : > { %p51_p10 = por %p2735_p9, %p2734_p3  ;;  %s205_s23 = sand.u32 1, %s1752_s16  }
  0x54   : > { %p2011_p7 = por %p2737_p5, %p2736_p2  ;;  %s39_s30 = ssub.s32 %s1898_s20, %s1958_s28 }
  0x55   : > { %p40_p13 = scmp.eq.s32.totalorder %s39_s30, 0  ;;  %s1036_s0 = sshll.u32 %s205_s23, 7 }
  0x56   : > { %s2738_s13 = scalar_select %p2011_p7, 1, 0 }
  0x57   : > { %p2739_p12 = scmp.lt.s32.totalorder %s1756_s17, 4  ;;  %s2818_s19 = smov (!%p51_p10, %s1895_s19), 0 }
  0x58   : > { %s2027_s14 = scalar_select %p40_p13, %s1752_s16, %s42_s5  }
  0x59   : > { %p2020_p6 = pnand %p2739_p12, %p51_p10  ;;  %p2742_p11 = pmov %p2739_p12 }
  0x5a   : > { %2741 = sst [smem:[#allocation37_spill]] %s2027_s14  ;;  %s209_s28 = scalar_lea.vmem [#allocation4], %s1036_s0 }
  0x5b   : > { %s1189_s12 = scalar_select %p51_p10, [#allocation3], [#allocation13] }
  0x5c   : > { %p2743_p8 = pmov %p2742_p11  ;;  %s218_s20 = sshll.u32 %s209_s28, 4  ;;  %s2034_s20 = int_to_ptr.vmem [resolvable:$true] %s218_s20 }
  0x5d   : > { %s2820_s12 = smov (!%p2742_p11, %s1189_s12), [#allocation17]  ;;  %p115_p0 = scmp.ne.s32.totalorder %s1728_s10, %s1724_s9 }
  0x5e   : > { %s2822_s19 = smov (!%p2743_p8, %s2818_s19), 0  ;;  %p121_p4 = scmp.ne.s32.totalorder %s1724_s9, %s1720_s8 }
  0x5f   : > { %s211_s26 = sld [smem:[%s2820_s12 + %s2822_s19]]  ;;  %s254_s4 = sand.u32 1, %s1728_s10  }
  0x60   : > { %s1187_s5 = smul.u32 96, %s1756_s17  ;;  %p2744_p3 = pmov %p2735_p9 }
  0x61   : > { %s2746_s1 = sld [smem:[#allocation39_spill]]  ;;  %p2747_p10 = pmov %p2737_p5 }
  0x62   : > { %p2045_p9 = por %p115_p0, %p2744_p3  ;;  %s2060_s19 = scalar_lea.sflag [#allocation5], %s205_s23 }
  0x63   : > { %p2056_p2 = por %p121_p4, %p2747_p10  ;;  %p1492_p13 = pneg %p2020_p6 }
  0x65   : > { %s1104_s30 = sshll.u32 %s211_s26, 11 }
  0x66   : > { %s2748_s8 = scalar_select %p2056_p2, 1, 0 }
  0x67   : > { %s2052_s0 = scalar_lea.hbm %s2746_s1, %s1104_s30  ;;  %s1495_s28 = scalar_lea.hbm %s2746_s1, 6144 }
  0x68   : > { %s1490_s12 = scalar_lea.hbm %s2052_s0, 2048  ;;  %p1496_p8 = scmp.lt.u32.totalorder %s2052_s0, %s2746_s1 }
  0x69   : > { %p1491_p5 = scmp.ne.s32.totalorder %s2052_s0, %s1490_s12  ;;  %p1497_p0 = scmp.lt.u32.totalorder %s1495_s28, %s1490_s12 }
  0x6a   : > { %p1499_p3 = scmp.lt.u32.totalorder %s1490_s12, %s2052_s0 }
  0x6b   : > { %p1493_p12 = pnand %p1492_p13, %p1491_p5  ;;  %p1498_p4 = por %p1497_p0, %p1496_p8 }
  0x6d   : > { %p1494_p11 = pneg %p1493_p12  ;;  %p1500_p10 = por %p1499_p3, %p1498_p4 }
  0x6f   : > { %p1501_p2 = pnand %p1500_p10, %p1494_p11 }
  0x71   : > { %1504 = shalt.err (!%p1501_p2)
}
  0x72   : > { %s1505_s23 = scalar_lea.vmem %s2034_s20, 2048  ;;  %s1762_s2 = smov [#allocation4]  }
  0x73   : > { %p1506_p5 = scmp.ne.s32.totalorder %s2034_s20, %s1505_s23  ;;  %s1510_s6 = sshll.u32 %s1762_s2, 4  ;;  %s1511_s6 = int_to_ptr.vmem [resolvable:$false] %s1510_s6 }
  0x74   : > { %s1512_s26 = scalar_lea.vmem %s1511_s6, 4096  ;;  %p1513_p1 = scmp.lt.s32.totalorder %s2034_s20, %s1511_s6 }
  0x75   : > { %p1508_p12 = pnand %p1506_p5, %p1492_p13  ;;  %p1514_p8 = scmp.lt.s32.totalorder %s1512_s26, %s1505_s23 }
  0x77   : > { %p1509_p7 = pneg %p1508_p12  ;;  %p1515_p0 = por %p1514_p8, %p1513_p1 }
  0x79   : > { %p1516_p4 = pnand %p1515_p0, %p1509_p7 }
  0x7b   : > { %1519 = shalt.err (!%p1516_p4)
}
  0x7c   : > { %s2749_s12 = smov 8   ;;  %s2750_s28 = smov 128  }
  0x7d   : > { %1212 = dma.hbm_to_vmem [thread:$0]  (!%p2020_p6), %s2052_s0, 2048, %s2034_s20, %s2060_s19, %s2750_s28, %s2750_s28, %s2749_s12  }
  0x7e   : > { %s1044_s30 = sshll.u32 %s254_s4, 7  ;;  %p2751_p1 = scmp.lt.s32.totalorder %s1756_s17, 4 }
  0x7f   : > { %s1195_s23 = scalar_select %p2045_p9, [#allocation3], [#allocation15] }
  0x80   : > { %p2097_p7 = pnand %p2751_p1, %p2045_p9  ;;  %p2753_p2 = pmov %p2751_p1 }
  0x81   : > { %s1196_s2 = scalar_select %p2045_p9, %s1912_s27, 0 }
  0x82   : > { %s2824_s23 = smov (!%p2753_p2, %s1195_s23), [#allocation19]  ;;  %p2754_p13 = pmov %p2751_p1 }
  0x83   : > { %s256_s6 = scalar_lea.vmem [#allocation9], %s1044_s30  ;;  %s2755_s3 = sld [smem:[#allocation41_spill]] }
  0x84   : > { %s2826_s2 = smov (!%p2754_p13, %s1196_s2), 0  ;;  %s267_s20 = sshll.u32 %s256_s6, 4  ;;  %s2110_s20 = int_to_ptr.vmem [resolvable:$true] %s267_s20 }
  0x85   : > { %s259_s0 = sld [smem:[%s2824_s23 + %s2826_s2]]  ;;  %p1522_p9 = pneg %p2097_p7 }
  0x89   : > { %s1525_s23 = scalar_lea.hbm %s2755_s3, 24576 }
  0x8b   : > { %s264_s4 = sadd.s32 %s1187_s5, %s259_s0 }
  0x8c   : > { %s1046_s19 = sshll.u32 %s264_s4, 6 }
  0x8d   : > { %s2117_s28 = scalar_lea.hbm %s2755_s3, %s1046_s19 }
  0x8e   : > { %s1520_s22 = scalar_lea.hbm %s2117_s28, 2048  ;;  %p1526_p10 = scmp.lt.u32.totalorder %s2117_s28, %s2755_s3 }
  0x8f   : > { %p1521_p6 = scmp.ne.s32.totalorder %s2117_s28, %s1520_s22  ;;  %p1527_p5 = scmp.lt.u32.totalorder %s1525_s23, %s1520_s22 }
  0x90   : > { %p1529_p8 = scmp.lt.u32.totalorder %s1520_s22, %s2117_s28 }
  0x91   : > { %p1523_p11 = pnand %p1522_p9, %p1521_p6  ;;  %p1528_p12 = por %p1527_p5, %p1526_p10 }
  0x93   : > { %p1524_p3 = pneg %p1523_p11  ;;  %p1530_p0 = por %p1529_p8, %p1528_p12 }
  0x95   : > { %p1531_p4 = pnand %p1530_p0, %p1524_p3 }
  0x97   : > { %1534 = shalt.err (!%p1531_p4)
}
  0x98   : > { %s1535_s0 = scalar_lea.vmem %s2110_s20, 2048  ;;  %s1763_s4 = smov [#allocation9]  }
  0x99   : > { %p1536_p1 = scmp.ne.s32.totalorder %s2110_s20, %s1535_s0  ;;  %s1540_s19 = sshll.u32 %s1763_s4, 4  ;;  %s1541_s19 = int_to_ptr.vmem [resolvable:$false] %s1540_s19 }
  0x9a   : > { %s1542_s26 = scalar_lea.vmem %s1541_s19, 4096  ;;  %p1543_p6 = scmp.lt.s32.totalorder %s2110_s20, %s1541_s19 }
  0x9b   : > { %p1538_p2 = pnand %p1536_p1, %p1522_p9  ;;  %p1544_p11 = scmp.lt.s32.totalorder %s1542_s26, %s1535_s0 }
  0x9d   : > { %p1539_p13 = pneg %p1538_p2  ;;  %p1545_p10 = por %p1544_p11, %p1543_p6 }
  0x9f   : > { %p1546_p5 = pnand %p1545_p10, %p1539_p13 }
  0xa1   : > { %1549 = shalt.err (!%p1546_p5)
}
  0xa2   : > { %s1764_s12 = smov 192   ;;  %s2756_s22 = sld [smem:[#allocation31_spill]] }
  0xa3   : > { %s2757_s30 = sld [smem:[#allocation30_spill]]  ;;  %s2758_s5 = sld [smem:[#allocation29_spill]] }
  0xa4   : > { %s1765_s23 = smov 64   ;;  %s1766_s2 = smov 4  }
  0xa5   : > { %1222 = dma.hbm_to_vmem [thread:$0]  (!%p2097_p7), %s2117_s28, 2048, %s2110_s20, %s1970_s29, %s1764_s12, %s1765_s23, %s1766_s2  }
  0xa6   : > { %s1025_s6 = sadd.s32 4294967294, %s1756_s17   ;;  %s2147_s0 = sadd.s32 1, %s1756_s17  }
  0xa7   : > { %s2759_s4 = sld [smem:[#allocation28_spill]]  ;;  %s101_s26 = sadd.s32 2, %s1901_s21 }
  0xa8   : > { %s99_s19 = sld [smem:[#allocation3 + %s1912_s27]]  ;;  %s103_s24 = ssub.s32 %s1756_s17, %s2147_s0 }
  0xa9   : > { %s102_s1 = sld [smem:[#allocation3 + %s101_s26]]  ;;  %s142_s16 = sadd.s32 1, %s1716_s7 }
  0xaa   : > { %s133_s3 = sld [smem:[#allocation3 + %s1912_s27]]  ;;  %p149_p9 = scmp.ne.s32.totalorder %s1716_s7, %s2756_s22 }
  0xab   : > { %s136_s14 = sld [smem:[#allocation3 + %s101_s26]]  ;;  %p155_p7 = scmp.ne.s32.totalorder %s2756_s22, %s2757_s30 }
  0xac   : > { %s2760_s29 = sld [smem:[#allocation27_spill]]  ;;  %p166_p3 = scmp.eq.s32.totalorder %s103_s24, 0 }
  0xad   : > { %s168_s25 = sadd.s32 1, %s2758_s5  ;;  %p2761_p12 = scmp.eq.s32.totalorder %s1756_s17, 0 }
  0xae   : > { %p2763_p0 = scmp.eq.s32.totalorder %s1892_s18, 0  ;;  %p178_p1 = scmp.ne.s32.totalorder %s2758_s5, %s2759_s4 }
  0xaf   : > { %p2162_p8 = por %p149_p9, %p2761_p12  ;;  %s104_s12 = ssub.s32 %s99_s19, %s102_s1 }
  0xb0   : > { %p2168_p4 = por %p155_p7, %p2763_p0  ;;  %s105_s22 = sor.u32 %s104_s12, %s103_s24 }
  0xb1   : > { %s2173_s28 = scalar_select %p166_p3, %s2758_s5, %s168_s25  }
  0xb2   : > { %s138_s30 = ssub.s32 %s133_s3, %s136_s14  ;;  %p106_p2 = scmp.eq.s32.totalorder %s105_s22, 0 }
  0xb3   : > { %s139_s23 = sor.u32 %s138_s30, %s103_s24  ;;  %p2765_p6 = scmp.eq.s32.totalorder %s1892_s18, 3 }
  0xb4   : > { %p140_p13 = scmp.eq.s32.totalorder %s139_s23, 0  ;;  %s2767_s26 = sadd.s32 1, %s1728_s10 }
  0xb5   : > { %p2179_p11 = por %p2765_p6, %p178_p1  ;;  %p184_p10 = scmp.ne.s32.totalorder %s2759_s4, %s2760_s29 }
  0xb6   : > { %s2186_s25 = scalar_select %p106_p2, %s1728_s10, %s2767_s26  }
  0xb7   : > { %s2766_s2 = scalar_select %p2179_p11, 1, 0 }
  0xb8   : > { %2768 = sst [smem:[#allocation38_spill]] %s2186_s25  ;;  %p185_p5 = scmp.eq.s32.totalorder %s1025_s6, 3 }
  0xb9   : > { %s2189_s1 = scalar_select %p140_p13, %s1716_s7, %s142_s16  }
  0xba   : > { %p2193_p9 = por %p185_p5, %p184_p10  ;;  %s277_s3 = sand.u32 1, %s1716_s7  }
  0xbb   : > { %p2770_p7 = scmp.lt.s32.totalorder %s1756_s17, 4  ;;  %s2828_s27 = smov (!%p2162_p8, %s1912_s27), 0 }
  0xbc   : > { %s2769_s5 = scalar_select %p2193_p9, 1, 0 }
  0xbd   : > { %p2202_p3 = pnand %p2770_p7, %p2162_p8  ;;  %p2772_p12 = pmov %p2770_p7 }
  0xbe   : > { %s1198_s24 = scalar_select %p2162_p8, [#allocation3], [#allocation16] }
  0xbf   : > { %p2773_p0 = pmov %p2770_p7  ;;  %s1188_s6 = smul.u32 3, %s1756_s17 }
  0xc0   : > { %s2830_s24 = smov (!%p2772_p12, %s1198_s24), [#allocation20]  ;;  %s280_s4 = scalar_lea.vmem [#allocation10], %s277_s3 }
  0xc1   : > { %s2832_s27 = smov (!%p2773_p0, %s2828_s27), 0  ;;  %s292_s19 = sshll.u32 %s280_s4, 4  ;;  %s2216_s19 = int_to_ptr.vmem [resolvable:$true] %s292_s19 }
  0xc2   : > { %s283_s16 = sld [smem:[%s2830_s24 + %s2832_s27]]  ;;  %s278_s20 = scalar_lea.sflag [#allocation11], %s277_s3 }
  0xc3   : > { %s2774_s23 = sld [smem:[#allocation42_spill]]  ;;  %p1552_p1 = pneg %p2202_p3 }
  0xc8   : > { %s288_s29 = sadd.s32 %s1188_s6, %s283_s16 }
  0xc9   : > { %s1048_s12 = sshll.u32 %s288_s29, 4  ;;  %s1555_s16 = scalar_lea.hbm %s2774_s23, 192 }
  0xca   : > { %s2221_s26 = scalar_lea.hbm %s2774_s23, %s1048_s12 }
  0xcb   : > { %s1550_s25 = scalar_lea.hbm %s2221_s26, 16  ;;  %p1556_p6 = scmp.lt.u32.totalorder %s2221_s26, %s2774_s23 }
  0xcc   : > { %p1551_p8 = scmp.ne.s32.totalorder %s2221_s26, %s1550_s25  ;;  %p1557_p10 = scmp.lt.u32.totalorder %s1555_s16, %s1550_s25 }
  0xcd   : > { %p1559_p7 = scmp.lt.u32.totalorder %s1550_s25, %s2221_s26 }
  0xce   : > { %p1553_p2 = pnand %p1552_p1, %p1551_p8  ;;  %p1558_p5 = por %p1557_p10, %p1556_p6 }
  0xd0   : > { %p1554_p13 = pneg %p1553_p2  ;;  %p1560_p12 = por %p1559_p7, %p1558_p5 }
  0xd2   : > { %p1561_p0 = pnand %p1560_p12, %p1554_p13 }
  0xd4   : > { %1564 = shalt.err (!%p1561_p0)
}
  0xd5   : > { %s1565_s3 = scalar_lea.vmem %s2216_s19, 16  ;;  %s1767_s29 = smov [#allocation10]  }
  0xd6   : > { %p1566_p8 = scmp.ne.s32.totalorder %s2216_s19, %s1565_s3  ;;  %s1570_s12 = sshll.u32 %s1767_s29, 4  ;;  %s1571_s12 = int_to_ptr.vmem [resolvable:$false] %s1570_s12 }
  0xd7   : > { %s1572_s22 = scalar_lea.vmem %s1571_s12, 32  ;;  %p1573_p11 = scmp.lt.s32.totalorder %s2216_s19, %s1571_s12 }
  0xd8   : > { %p1568_p2 = pnand %p1566_p8, %p1552_p1  ;;  %p1574_p6 = scmp.lt.s32.totalorder %s1572_s22, %s1565_s3 }
  0xda   : > { %p1569_p9 = pneg %p1568_p2  ;;  %p1575_p10 = por %p1574_p6, %p1573_p11 }
  0xdc   : > { %p1576_p5 = pnand %p1575_p10, %p1569_p9 }
  0xde   : > { %1579 = shalt.err (!%p1576_p5)
}
  0xdf   : > { %1227 = dma.hbm_to_vmem [thread:$0]  (!%p2202_p3), %s2221_s26, 16, %s2216_s19, %s278_s20  }
  0xe0   : > { %p2775_p13 = scmp.ne.s32.totalorder %s2732_s11, 0 }
  0xe1   : > { %s303_s25 = sand.u32 (!%p2775_p13), 1, %s1748_s15   ;;  %p2776_p1 = scmp.ne.s32.totalorder (!%p2775_p13), %s2738_s13, 0 }
  0xe2   : > { %301 = sbr.rel (%p2775_p13) target bundleno = 632 (0x278), region = 36  ;;  %s1050_s30 = sshll.u32 (!%p2775_p13), %s303_s25, 7 }
  0xe3   : > { %s304_s27 = scalar_lea.sflag (!%p2775_p13), [#allocation5], %s303_s25  ;;  %s2251_s24 = scalar_lea.vmem (!%p2775_p13), [#allocation4], %s1050_s30 }
  0xe9   : > { %1675 = dma.done.wait (%p2776_p1), %s304_s27, 2048  }
  0xea   : > { %1677 = vsyncadd (%p2776_p1), %s304_s27, 4294965248  ;;  %s2777_s14 = sld [smem:[#allocation32_spill]]  ;;  %s312_s6 = sand.u32 1, %s1892_s18  }
  0xeb   : > { %s2778_s16 = sld [smem:[#allocation35_spill]]  ;;  %s313_s11 = scalar_lea.sflag [#allocation8], %s312_s6 }
  0xf0   : > { %s314_s19 = sand.u32 1, %s2777_s14  }
  0xf1   : > { %s1051_s26 = sshll.u32 %s314_s19, 7  ;;  %p2779_p11 = scmp.ne.s32.totalorder %s2778_s16, 0 }
  0xf2   : > { %s2259_s20 = scalar_lea.vmem [#allocation7], %s1051_s26 }
  0xf3   : > { %1679 = dma.done.wait (%p2779_p11), %s313_s11, 2048  }
  0xf4   : > { %1681 = vsyncadd (%p2779_p11), %s313_s11, 4294965248  ;;  %s323_s4 = sand.u32 1, %s1724_s9   ;;  %p2780_p9 = scmp.ne.s32.totalorder %s2748_s8, 0 }
  0xf5   : > { %s1052_s3 = sshll.u32 %s323_s4, 7 }
  0xf6   : > { %s2266_s13 = scalar_lea.vmem [#allocation9], %s1052_s3 }
  0xf7   : > { %1683 = dma.done.wait (%p2780_p9), %s313_s11, 2048  }
  0xf8   : > { %1685 = vsyncadd (%p2780_p9), %s313_s11, 4294965248  ;;  %s2781_s29 = sld [smem:[#allocation31_spill]] }
  0xfe   : > { %s330_s12 = sand.u32 1, %s2781_s29  }
  0xff   : > { %s331_s22 = scalar_lea.sflag [#allocation11], %s330_s12  ;;  %s2273_s25 = scalar_lea.vmem [#allocation10], %s330_s12 }
 0x100   : > { %1687 = dma.done.wait (%p2168_p4), %s331_s22, 16  }
 0x101   : > { %1689 = vsyncadd (%p2168_p4), %s331_s22, 4294967280  ;;  %s2782_s30 = sld [smem:[#allocation28_spill]]  ;;  %s1071_s8 = sshll.u32 %s1892_s18, 7  ;;  %v1370_v0 = vld [vmem:[%s2266_s13 + $0x40] sm:$0xff]   ;;  %v1372_v2 = vld [vmem:[%s2266_s13 + $0x48] sm:$0xff]  }
 0x102   : > { %s665_s14 = sadd.s32 2, %s1071_s8  ;;  %v1371_v1 = vld [vmem:[%s2266_s13] sm:$0xff]   ;;  %1107 = vmatprep.subr.bf16.mxu0 %v1370_v0  ;;  %1171 = vmatprep.subr.bf16.mxu1 %v1370_v0  ;;  %v1373_v3 = vld [vmem:[%s2266_s13 + $0x8] sm:$0xff]   ;;  %v1374_v4 = vld [vmem:[%s2266_s13 + $0x50] sm:$0xff]  }
 0x103   : > { %s2285_s6 = sld [smem:[#allocation3 + %s665_s14]]  ;;  %1108 = vmatpush3.bf16.msra.mxu0 %v1371_v1  ;;  %1179 = vmatpush3.bf16.msra.mxu1 %v1371_v1  ;;  %v1375_v5 = vld [vmem:[%s2266_s13 + $0x10] sm:$0xff]   ;;  %v1376_v6 = vld [vmem:[%s2266_s13 + $0x58] sm:$0xff]   ;;  %v1378_v8 = vld [vmem:[%s2266_s13 + $0x60] sm:$0xff]  }
 0x104   : > { %1109 = vmatprep.subr.bf16.mxu0 %v1372_v2  ;;  %1172 = vmatprep.subr.bf16.mxu1 %v1372_v2  ;;  %v1377_v7 = vld [vmem:[%s2266_s13 + $0x18] sm:$0xff]   ;;  %v1379_v9 = vld [vmem:[%s2266_s13 + $0x20] sm:$0xff]   ;;  %v1380_v10 = vld [vmem:[%s2266_s13 + $0x68] sm:$0xff]  }
 0x105   : > { %v2299_v11 = vld [vmem:[%s2259_s20] sm:$0xff]  ;;  %v2302_v12 = vld [vmem:[%s2259_s20 + $0x8] sm:$0xff]  ;;  %v1382_v18 = vld [vmem:[%s2266_s13 + $0x70] sm:$0xff]  }
 0x106   : > { %v2305_v13 = vld [vmem:[%s2259_s20 + $0x40] sm:$0xff]  ;;  %v424_v14 = vpack.c.bf16 %v2302_v12, %v2299_v11  ;;  %v2310_v15 = vld [vmem:[%s2259_s20 + $0x48] sm:$0xff]  ;;  %v1383_v19 = vld [vmem:[%s2266_s13 + $0x30] sm:$0xff]  }
 0x107   : > { %s369_s27 = sand.u32 1, %s2782_s30   ;;  %1110 = vmatpush3.bf16.msra.mxu0 %v1373_v3  ;;  %1180 = vmatpush3.bf16.msra.mxu1 %v1373_v3  ;;  %v428_v16 = vpack.c.bf16 %v2310_v15, %v2305_v13  ;;  %v1381_v17 = vld [vmem:[%s2266_s13 + $0x28] sm:$0xff]   ;;  %v1384_v20 = vld [vmem:[%s2266_s13 + $0x78] sm:$0xff]   ;;  %v2320_v22 = vld [vmem:[%s2251_s24] sm:$0xff] }
 0x108   : > { %s2283_s16 = sshll.u32 %s369_s27, 7  ;;  %1111 = vmatprep.subr.bf16.mxu0 %v1374_v4  ;;  %1173 = vmatprep.subr.bf16.mxu1 %v1374_v4  ;;  %v1385_v21 = vld [vmem:[%s2266_s13 + $0x38] sm:$0xff]   ;;  %v2323_v23 = vld [vmem:[%s2251_s24 + $0x8] sm:$0xff]  ;;  %v2326_v24 = vld [vmem:[%s2251_s24 + $0x40] sm:$0xff] }
 0x109   : > { %599 = vmatprep.mubr.bf16.mxu0 %v424_v14  ;;  %631 = vmatprep.mubr.bf16.mxu1 %v428_v16  ;;  %v2329_v25 = vld [vmem:[%s2251_s24 + $0x48] sm:$0xff]  ;;  %v2332_v26 = vld [vmem:[%s2259_s20 + $0x10] sm:$0xff]  ;;  %v2335_v27 = vld [vmem:[%s2259_s20 + $0x18] sm:$0xff]  ;;  %v416_v30 = vpack.c.bf16 %v2323_v23, %v2320_v22  ;;  %s2465_s21 = scalar_lea.vmem [#allocation12], %s2283_s16  ;;  %p1072_p4 = scmp.ne.s32.totalorder %s2285_s6, 0 }
 0x10a   : > { %v2338_v28 = vld [vmem:[%s2259_s20 + $0x50] sm:$0xff]  ;;  %v2341_v29 = vld [vmem:[%s2259_s20 + $0x58] sm:$0xff]  ;;  %v420_v31 = vpack.c.bf16 %v2329_v25, %v2326_v24  ;;  %v425_v32 = vpack.c.bf16 %v2335_v27, %v2332_v26  ;;  %v2364_v38 = vld [vmem:[%s2259_s20 + $0x20] sm:$0xff] }
 0x10b   : > { %1112 = vmatpush3.bf16.msra.mxu0 %v1375_v5  ;;  %1181 = vmatpush3.bf16.msra.mxu1 %v1375_v5  ;;  %v429_v33 = vpack.c.bf16 %v2341_v29, %v2338_v28  ;;  %v2352_v34 = vld [vmem:[%s2251_s24 + $0x10] sm:$0xff]  ;;  %v2355_v35 = vld [vmem:[%s2251_s24 + $0x18] sm:$0xff]  ;;  %v2367_v39 = vld [vmem:[%s2259_s20 + $0x28] sm:$0xff] }
 0x10c   : > { %1113 = vmatprep.subr.bf16.mxu0 %v1376_v6  ;;  %1174 = vmatprep.subr.bf16.mxu1 %v1376_v6  ;;  %v2358_v36 = vld [vmem:[%s2251_s24 + $0x50] sm:$0xff]  ;;  %v2361_v37 = vld [vmem:[%s2251_s24 + $0x58] sm:$0xff]  ;;  %v2370_v40 = vld [vmem:[%s2259_s20 + $0x60] sm:$0xff]  ;;  %v417_v42 = vpack.c.bf16 %v2355_v35, %v2352_v34  ;;  %v426_v44 = vpack.c.bf16 %v2367_v39, %v2364_v38 }
 0x10d   : > { %v2373_v41 = vld [vmem:[%s2259_s20 + $0x68] sm:$0xff]  ;;  %v421_v43 = vpack.c.bf16 %v2361_v37, %v2358_v36  ;;  %v2384_v46 = vld [vmem:[%s2251_s24 + $0x20] sm:$0xff]  ;;  %v2396_v50 = vld [vmem:[%s2259_s20 + $0x30] sm:$0xff] }
 0x10e   : > { %v430_v45 = vpack.c.bf16 %v2373_v41, %v2370_v40  ;;  %v2387_v47 = vld [vmem:[%s2251_s24 + $0x28] sm:$0xff]  ;;  %v2390_v48 = vld [vmem:[%s2251_s24 + $0x60] sm:$0xff]  ;;  %v2399_v51 = vld [vmem:[%s2259_s20 + $0x38] sm:$0xff] }
 0x10f   : > { %1114 = vmatpush3.bf16.msra.mxu0 %v1377_v7  ;;  %1182 = vmatpush3.bf16.msra.mxu1 %v1377_v7  ;;  %v2393_v49 = vld [vmem:[%s2251_s24 + $0x68] sm:$0xff]  ;;  %v2402_v52 = vld [vmem:[%s2259_s20 + $0x70] sm:$0xff]  ;;  %v2405_v53 = vld [vmem:[%s2259_s20 + $0x78] sm:$0xff]  ;;  %v418_v54 = vpack.c.bf16 %v2387_v47, %v2384_v46  ;;  %v427_v56 = vpack.c.bf16 %v2399_v51, %v2396_v50 }
 0x110   : > { %1115 = vmatprep.subr.bf16.mxu0 %v1378_v8  ;;  %1175 = vmatprep.subr.bf16.mxu1 %v1378_v8  ;;  %v422_v55 = vpack.c.bf16 %v2393_v49, %v2390_v48  ;;  %v431_v57 = vpack.c.bf16 %v2405_v53, %v2402_v52  ;;  %v2416_v58 = vld [vmem:[%s2251_s24 + $0x30] sm:$0xff]  ;;  %v2419_v59 = vld [vmem:[%s2251_s24 + $0x38] sm:$0xff]  ;;  %v1054_v2 = vld [vmem:[%s2273_s25] ss:$0 sm:$0xff] }
 0x111   : > { %v2422_v60 = vld [vmem:[%s2251_s24 + $0x70] sm:$0xff]  ;;  %v2425_v61 = vld [vmem:[%s2251_s24 + $0x78] sm:$0xff]  ;;  %v419_v62 = vpack.c.bf16 %v2419_v59, %v2416_v58 }
 0x112   : > { %v423_v63 = vpack.c.bf16 %v2425_v61, %v2422_v60 }
 0x113   : > { %1116 = vmatpush3.bf16.msra.mxu0 %v1379_v9  ;;  %1183 = vmatpush3.bf16.msra.mxu1 %v1379_v9 }
 0x114   : > { %1117 = vmatprep.subr.bf16.mxu0 %v1380_v10  ;;  %1176 = vmatprep.subr.bf16.mxu1 %v1380_v10 }
 0x117   : > { %1118 = vmatpush3.bf16.msra.mxu0 %v1381_v17  ;;  %1184 = vmatpush3.bf16.msra.mxu1 %v1381_v17 }
 0x118   : > { %1119 = vmatprep.subr.bf16.mxu0 %v1382_v18  ;;  %1177 = vmatprep.subr.bf16.mxu1 %v1382_v18 }
 0x11b   : > { %1120 = vmatpush3.bf16.msra.mxu0 %v1383_v19  ;;  %1185 = vmatpush3.bf16.msra.mxu1 %v1383_v19 }
 0x11c   : > { %1121 = vmatprep.subr.bf16.mxu0 %v1384_v20  ;;  %1178 = vmatprep.subr.bf16.mxu1 %v1384_v20 }
 0x11f   : > { %1122 = vmatpush3.bf16.msra.mxu0 %v1385_v21  ;;  %1186 = vmatpush3.bf16.msra.mxu1 %v1385_v21 }
 0x122   : > { %600 = vmatmul.mubr.bf16.vlgmr.msra.gmra.mrb[0].mxu0 %v416_v30  ;;  %632 = vmatmul.mubr.bf16.vlgmr.msra.gmra.mrb[0].mxu1 %v420_v31 }
 0x123   : > { %607 = vmatprep.mubr.bf16.mxu0 %v425_v32  ;;  %639 = vmatprep.mubr.bf16.mxu1 %v429_v33 }
 0x12a   : > { %608 = vmatmul.mubr.bf16.gmra.mrb[4].mxu0 %v417_v42  ;;  %640 = vmatmul.mubr.bf16.gmra.mrb[4].mxu1 %v421_v43 }
 0x12b   : > { %615 = vmatprep.mubr.bf16.mxu0 %v426_v44  ;;  %647 = vmatprep.mubr.bf16.mxu1 %v430_v45 }
 0x132   : > { %616 = vmatmul.mubr.bf16.gmra.mrb[8].mxu0 %v418_v54  ;;  %648 = vmatmul.mubr.bf16.gmra.mrb[8].mxu1 %v422_v55 }
 0x133   : > { %623 = vmatprep.mubr.bf16.mxu0 %v427_v56  ;;  %655 = vmatprep.mubr.bf16.mxu1 %v431_v57 }
 0x13a   : > { %624 = vmatmul.mubr.bf16.gmra.mrb[12].mxu0 %v419_v62  ;;  %656 = vmatmul.mubr.bf16.gmra.mrb[12].mxu1 %v423_v63 }
 0x1f5   : > { %v1123_v0 = vpop.f32.mrb[0].mxu0  ;;  %v1147_v1 = vpop.f32.mrb[0].mxu1 }
 0x1f6   : > { %v1124_v3 = vpop.f32.mrb[1].mxu0  ;;  %v1148_v4 = vpop.f32.mrb[1].mxu1 }
 0x1f7   : > { %v1125_v5 = vadd.f32 %v1124_v3, %v1123_v0  ;;  %v1149_v6 = vadd.f32 %v1148_v4, %v1147_v1  ;;  %v1126_v7 = vpop.f32.mrb[2].mxu0  ;;  %v1150_v8 = vpop.f32.mrb[2].mxu1 }
 0x1f8   : > { %v1127_v9 = vpop.f32.mrb[3].mxu0  ;;  %v1151_v10 = vpop.f32.mrb[3].mxu1 }
 0x1f9   : > { %v2432_v14 = vadd.f32 %v1125_v5, %v1054_v2  ;;  %v2434_v16 = vadd.f32 %v1149_v6, %v1054_v2  ;;  %v1128_v17 = vadd.f32 %v1127_v9, %v1126_v7  ;;  %v1152_v18 = vadd.f32 %v1151_v10, %v1150_v8 }
 0x1fb   : > { %v2436_v19 = vadd.f32 %v1128_v17, %v1054_v2  ;;  %v2438_v20 = vadd.f32 %v1152_v18, %v1054_v2 }
 0x1fd   : > { %v1129_v21 = vpop.f32.mrb[4].mxu0  ;;  %v1153_v30 = vpop.f32.mrb[4].mxu1 }
 0x1fe   : > { %v1130_v31 = vpop.f32.mrb[5].mxu0  ;;  %v1154_v32 = vpop.f32.mrb[5].mxu1 }
 0x1ff   : > { %v1131_v33 = vadd.f32 %v1130_v31, %v1129_v21  ;;  %v1155_v42 = vadd.f32 %v1154_v32, %v1153_v30  ;;  %v1132_v43 = vpop.f32.mrb[6].mxu0  ;;  %v1156_v44 = vpop.f32.mrb[6].mxu1 }
 0x200   : > { %v1133_v45 = vpop.f32.mrb[7].mxu0  ;;  %v1157_v54 = vpop.f32.mrb[7].mxu1 }
 0x201   : > { %v2440_v55 = vadd.f32 %v1131_v33, %v1054_v2  ;;  %v2442_v56 = vadd.f32 %v1155_v42, %v1054_v2  ;;  %v1134_v57 = vadd.f32 %v1133_v45, %v1132_v43  ;;  %v1158_v62 = vadd.f32 %v1157_v54, %v1156_v44 }
 0x203   : > { %v2444_v63 = vadd.f32 %v1134_v57, %v1054_v2  ;;  %v2446_v0 = vadd.f32 %v1158_v62, %v1054_v2 }
 0x205   : > { %v1135_v1 = vpop.f32.mrb[8].mxu0  ;;  %v1159_v3 = vpop.f32.mrb[8].mxu1 }
 0x206   : > { %v1136_v4 = vpop.f32.mrb[9].mxu0  ;;  %v1160_v5 = vpop.f32.mrb[9].mxu1 }
 0x207   : > { %v1137_v6 = vadd.f32 %v1136_v4, %v1135_v1  ;;  %v1161_v7 = vadd.f32 %v1160_v5, %v1159_v3  ;;  %v1138_v8 = vpop.f32.mrb[10].mxu0  ;;  %v1162_v9 = vpop.f32.mrb[10].mxu1 }
 0x208   : > { %v1139_v10 = vpop.f32.mrb[11].mxu0  ;;  %v1163_v17 = vpop.f32.mrb[11].mxu1 }
 0x209   : > { %v2448_v18 = vadd.f32 %v1137_v6, %v1054_v2  ;;  %v2450_v21 = vadd.f32 %v1161_v7, %v1054_v2  ;;  %v1140_v30 = vadd.f32 %v1139_v10, %v1138_v8  ;;  %v1164_v31 = vadd.f32 %v1163_v17, %v1162_v9 }
 0x20a   : > { %v671_v17 = vmax.f32 (!%p1072_p4), %v2432_v14, 0.0 }
 0x20b   : > { %v2452_v32 = vadd.f32 %v1140_v30, %v1054_v2  ;;  %v2454_v33 = vadd.f32 %v1164_v31, %v1054_v2  ;;  %v672_v30 = vmax.f32 (!%p1072_p4), %v2436_v19, 0.0  ;;  %v673_v31 = vmax.f32 (!%p1072_p4), %v2440_v55, 0.0 }
 0x20c   : > { %687 = vst [vmem:[%s2465_s21] sm:$0xff] (!%p1072_p4), %v671_v17 }
 0x20d   : > { %v1141_v42 = vpop.f32.mrb[12].mxu0  ;;  %v1165_v43 = vpop.f32.mrb[12].mxu1  ;;  %670 = sbr.rel (%p1072_p4) target bundleno = 538 (0x21a), region = 56  ;;  %688 = vst [vmem:[%s2465_s21 + $0x8] sm:$0xff] (!%p1072_p4), %v672_v30  ;;  %689 = vst [vmem:[%s2465_s21 + $0x10] sm:$0xff] (!%p1072_p4), %v673_v31 }
 0x20e   : > { %v1142_v44 = vpop.f32.mrb[13].mxu0  ;;  %v1166_v45 = vpop.f32.mrb[13].mxu1 }
 0x20f   : > { %v1143_v54 = vadd.f32 %v1142_v44, %v1141_v42  ;;  %v1167_v57 = vadd.f32 %v1166_v45, %v1165_v43  ;;  %v1144_v62 = vpop.f32.mrb[14].mxu0  ;;  %v1168_v1 = vpop.f32.mrb[14].mxu1  ;;  %v675_v42 = vmax.f32 (!%p1072_p4), %v2448_v18, 0.0  ;;  %v676_v43 = vmax.f32 (!%p1072_p4), %v2452_v32, 0.0 }
 0x210   : > { %v1145_v3 = vpop.f32.mrb[15].mxu0  ;;  %v1169_v4 = vpop.f32.mrb[15].mxu1 }
 0x211   : > { %v2456_v5 = vadd.f32 %v1143_v54, %v1054_v2  ;;  %v2458_v6 = vadd.f32 %v1167_v57, %v1054_v2  ;;  %v1146_v7 = vadd.f32 %v1145_v3, %v1144_v62  ;;  %v1170_v8 = vadd.f32 %v1169_v4, %v1168_v1  ;;  %691 = vst [vmem:[%s2465_s21 + $0x20] sm:$0xff] (!%p1072_p4), %v675_v42 }
 0x212   : > { %v679_v54 = vmax.f32 (!%p1072_p4), %v2434_v16, 0.0  ;;  %v680_v57 = vmax.f32 (!%p1072_p4), %v2438_v20, 0.0  ;;  %v681_v62 = vmax.f32 (!%p1072_p4), %v2442_v56, 0.0  ;;  %v682_v1 = vmax.f32 (!%p1072_p4), %v2446_v0, 0.0  ;;  %692 = vst [vmem:[%s2465_s21 + $0x28] sm:$0xff] (!%p1072_p4), %v676_v43 }
 0x213   : > { %v2460_v9 = vadd.f32 %v1146_v7, %v1054_v2  ;;  %v2462_v10 = vadd.f32 %v1170_v8, %v1054_v2  ;;  %v674_v2 = vmax.f32 (!%p1072_p4), %v2444_v63, 0.0  ;;  %v677_v44 = vmax.f32 (!%p1072_p4), %v2456_v5, 0.0 }
 0x214   : > { %v683_v3 = vmax.f32 %v2450_v21, 0.0  ;;  %v684_v4 = vmax.f32 %v2454_v33, 0.0  ;;  %v685_v7 = vmax.f32 %v2458_v6, 0.0  ;;  %695 = vst [vmem:[%s2465_s21 + $0x40] sm:$0xff] %v679_v54  ;;  %696 = vst [vmem:[%s2465_s21 + $0x48] sm:$0xff] %v680_v57 }
 0x215   : > { %v678_v45 = vmax.f32 %v2460_v9, 0.0  ;;  %690 = vst [vmem:[%s2465_s21 + $0x18] sm:$0xff] %v674_v2  ;;  %693 = vst [vmem:[%s2465_s21 + $0x30] sm:$0xff] %v677_v44  ;;  %v686_v8 = vmax.f32 %v2462_v10, 0.0 }
 0x216   : > { %697 = vst [vmem:[%s2465_s21 + $0x50] sm:$0xff] %v681_v62  ;;  %698 = vst [vmem:[%s2465_s21 + $0x58] sm:$0xff] %v682_v1 }
 0x217   : > { %694 = vst [vmem:[%s2465_s21 + $0x38] sm:$0xff] %v678_v45  ;;  %699 = vst [vmem:[%s2465_s21 + $0x60] sm:$0xff] %v683_v3 }
 0x218   : > { %700 = vst [vmem:[%s2465_s21 + $0x68] sm:$0xff] %v684_v4  ;;  %701 = vst [vmem:[%s2465_s21 + $0x70] sm:$0xff] %v685_v7 }
 0x219   : > { %702 = vst [vmem:[%s2465_s21 + $0x78] sm:$0xff] %v686_v8 }
 0x21a PF: > { %p1073_p3 = scmp.ne.s32.totalorder %s2285_s6, 1 }
 0x21b   : > { %707 = vst [vmem:[%s2465_s21] sm:$0xff] (!%p1073_p3), %v2432_v14  ;;  %708 = vst [vmem:[%s2465_s21 + $0x8] sm:$0xff] (!%p1073_p3), %v2436_v19 }
 0x21c   : > { %706 = sbr.rel (%p1073_p3) target bundleno = 547 (0x223), region = 60  ;;  %709 = vst [vmem:[%s2465_s21 + $0x10] sm:$0xff] (!%p1073_p3), %v2440_v55  ;;  %710 = vst [vmem:[%s2465_s21 + $0x18] sm:$0xff] (!%p1073_p3), %v2444_v63 }
 0x21d   : > { %711 = vst [vmem:[%s2465_s21 + $0x20] sm:$0xff] (!%p1073_p3), %v2448_v18  ;;  %712 = vst [vmem:[%s2465_s21 + $0x28] sm:$0xff] (!%p1073_p3), %v2452_v32 }
 0x21e   : > { %713 = vst [vmem:[%s2465_s21 + $0x30] sm:$0xff] (!%p1073_p3), %v2456_v5  ;;  %714 = vst [vmem:[%s2465_s21 + $0x38] sm:$0xff] (!%p1073_p3), %v2460_v9 }
 0x21f   : > { %715 = vst [vmem:[%s2465_s21 + $0x40] sm:$0xff] (!%p1073_p3), %v2434_v16  ;;  %716 = vst [vmem:[%s2465_s21 + $0x48] sm:$0xff] (!%p1073_p3), %v2438_v20 }
 0x220   : > { %717 = vst [vmem:[%s2465_s21 + $0x50] sm:$0xff] (!%p1073_p3), %v2442_v56  ;;  %718 = vst [vmem:[%s2465_s21 + $0x58] sm:$0xff] (!%p1073_p3), %v2446_v0 }
 0x221   : > { %719 = vst [vmem:[%s2465_s21 + $0x60] sm:$0xff] (!%p1073_p3), %v2450_v21  ;;  %720 = vst [vmem:[%s2465_s21 + $0x68] sm:$0xff] (!%p1073_p3), %v2454_v33 }
 0x222   : > { %721 = vst [vmem:[%s2465_s21 + $0x70] sm:$0xff] (!%p1073_p3), %v2458_v6  ;;  %722 = vst [vmem:[%s2465_s21 + $0x78] sm:$0xff] (!%p1073_p3), %v2462_v10 }
 0x223 PF: > { %p1074_p7 = scmp.ne.s32.totalorder %s2285_s6, 2 }
 0x224   : > { %v1075_v17 = vmul.f32 (!%p1074_p7), -1.442695, %v2432_v14  ;;  %v1076_v30 = vmul.f32 (!%p1074_p7), -1.442695, %v2436_v19  ;;  %v1077_v31 = vmul.f32 (!%p1074_p7), -1.442695, %v2440_v55 }
 0x225   : > { %726 = sbr.rel (%p1074_p7) target bundleno = 605 (0x25d), region = 64  ;;  %v1078_v2 = vmul.f32 (!%p1074_p7), -1.442695, %v2444_v63  ;;  %v1079_v42 = vmul.f32 (!%p1074_p7), -1.442695, %v2448_v18 }
 0x226   : > { %1386 = vpow2.f32 (!%p1074_p7), %v1075_v17  ;;  %v1080_v43 = vmul.f32 (!%p1074_p7), -1.442695, %v2452_v32  ;;  %v1081_v44 = vmul.f32 (!%p1074_p7), -1.442695, %v2456_v5  ;;  %v1082_v45 = vmul.f32 (!%p1074_p7), -1.442695, %v2460_v9 }
 0x227   : > { %1388 = vpow2.f32 (!%p1074_p7), %v1076_v30  ;;  %v1083_v14 = vmul.f32 (!%p1074_p7), -1.442695, %v2434_v16  ;;  %v1084_v19 = vmul.f32 (!%p1074_p7), -1.442695, %v2438_v20  ;;  %v1085_v55 = vmul.f32 (!%p1074_p7), -1.442695, %v2442_v56 }
 0x228   : > { %1390 = vpow2.f32 (!%p1074_p7), %v1077_v31  ;;  %v1086_v63 = vmul.f32 (!%p1074_p7), -1.442695, %v2446_v0  ;;  %v1087_v18 = vmul.f32 (!%p1074_p7), -1.442695, %v2450_v21 }
 0x229   : > { %1392 = vpow2.f32 (!%p1074_p7), %v1078_v2 }
 0x22a   : > { %1394 = vpow2.f32 (!%p1074_p7), %v1079_v42  ;;  %v823_v42 = vadd.f32 (!%p1074_p7), %v2299_v11, %v2320_v22  ;;  %v826_v11 = vadd.f32 (!%p1074_p7), %v2335_v27, %v2355_v35 }
 0x22b   : > { %1396 = vpow2.f32 (!%p1074_p7), %v1080_v43 }
 0x22c   : > { %1398 = vpow2.f32 %v1081_v44 }
 0x22d   : > { %1400 = vpow2.f32 %v1082_v45  ;;  %v824_v45 = vadd.f32 %v2302_v12, %v2323_v23 }
 0x22e   : > { %1402 = vpow2.f32 %v1083_v14 }
 0x22f   : > { %1404 = vpow2.f32 %v1084_v19 }
 0x230   : > { %v1387_v32 = vpop.eup %1386  ;;  %1406 = vpow2.f32 %v1085_v55  ;;  %v825_v55 = vadd.f32 %v2332_v26, %v2352_v34  ;;  %v1090_v26 = vmul.f32 -1.442695, %v2462_v10  ;;  %v830_v10 = vadd.f32 %v2399_v51, %v2419_v59 }
 0x231   : > { %v1389_v5 = vpop.eup %1388  ;;  %v775_v9 = vadd.f32 1.0, %v1387_v32  ;;  %1408 = vpow2.f32 %v1086_v63  ;;  %v833_v59 = vadd.f32 %v2338_v28, %v2358_v36 }
 0x232   : > { %v1391_v54 = vpop.eup %1390  ;;  %v776_v16 = vadd.f32 1.0, %v1389_v5  ;;  %1410 = vpow2.f32 %v1087_v18  ;;  %v1088_v18 = vmul.f32 -1.442695, %v2454_v33  ;;  %v1089_v5 = vmul.f32 -1.442695, %v2458_v6 }
 0x233   : > { %v1393_v57 = vpop.eup %1392  ;;  %1412 = vrcp.f32 %v775_v9  ;;  %v777_v20 = vadd.f32 1.0, %v1391_v54  ;;  %v827_v9 = vadd.f32 %v2364_v38, %v2384_v46  ;;  %v828_v54 = vadd.f32 %v2367_v39, %v2387_v47 }
 0x234   : > { %v1395_v62 = vpop.eup %1394  ;;  %1414 = vrcp.f32 %v776_v16  ;;  %v778_v56 = vadd.f32 1.0, %v1393_v57  ;;  %v829_v6 = vadd.f32 %v2396_v50, %v2416_v58  ;;  %v831_v47 = vadd.f32 %v2305_v13, %v2326_v24 }
 0x235   : > { %v1397_v1 = vpop.eup %1396  ;;  %1416 = vrcp.f32 %v777_v20  ;;  %v779_v0 = vadd.f32 1.0, %v1395_v62  ;;  %v832_v58 = vadd.f32 %v2310_v15, %v2329_v25  ;;  %v834_v13 = vadd.f32 %v2341_v29, %v2361_v37 }
 0x236   : > { %v1399_v3 = vpop.eup %1398  ;;  %1418 = vrcp.f32 %v778_v56  ;;  %v780_v21 = vadd.f32 1.0, %v1397_v1  ;;  %v835_v15 = vadd.f32 %v2370_v40, %v2390_v48 }
 0x237   : > { %v1401_v4 = vpop.eup %1400  ;;  %1420 = vrcp.f32 %v779_v0  ;;  %v781_v7 = vadd.f32 1.0, %v1399_v3 }
 0x238   : > { %v1403_v8 = vpop.eup %1402  ;;  %1422 = vrcp.f32 %v780_v21  ;;  %v782_v17 = vadd.f32 1.0, %v1401_v4 }
 0x239   : > { %v1405_v30 = vpop.eup %1404  ;;  %1424 = vrcp.f32 %v781_v7  ;;  %v783_v31 = vadd.f32 1.0, %v1403_v8 }
 0x23a   : > { %v1407_v2 = vpop.eup %1406  ;;  %1426 = vrcp.f32 %v782_v17  ;;  %v784_v43 = vadd.f32 1.0, %v1405_v30  ;;  %v836_v17 = vadd.f32 %v2373_v41, %v2393_v49  ;;  %v837_v30 = vadd.f32 %v2402_v52, %v2422_v60 }
 0x23b   : > { %v1409_v44 = vpop.eup %1408  ;;  %1428 = vrcp.f32 %v783_v31  ;;  %v785_v14 = vadd.f32 1.0, %v1407_v2  ;;  %v838_v31 = vadd.f32 %v2405_v53, %v2425_v61 }
 0x23c   : > { %v1411_v19 = vpop.eup %1410  ;;  %1430 = vrcp.f32 %v784_v43  ;;  %v786_v63 = vadd.f32 1.0, %v1409_v44 }
 0x23d   : > { %v1413_v32 = vpop.eup %1412  ;;  %1432 = vrcp.f32 %v785_v14  ;;  %v787_v22 = vadd.f32 1.0, %v1411_v19 }
 0x23e   : > { %v1415_v12 = vpop.eup %1414  ;;  %v839_v23 = vmul.f32 %v1413_v32, %v823_v42  ;;  %1434 = vrcp.f32 %v786_v63 }
 0x23f   : > { %v1417_v34 = vpop.eup %1416  ;;  %v840_v33 = vmul.f32 %v1415_v12, %v824_v45  ;;  %1436 = vrcp.f32 %v787_v22 }
 0x240   : > { %v1419_v27 = vpop.eup %1418  ;;  %855 = vst [vmem:[%s2465_s21] sm:$0xff] %v839_v23  ;;  %v841_v35 = vmul.f32 %v1417_v34, %v825_v55  ;;  %1438 = vpow2.f32 %v1088_v18 }
 0x241   : > { %v1421_v38 = vpop.eup %1420  ;;  %856 = vst [vmem:[%s2465_s21 + $0x8] sm:$0xff] %v840_v33  ;;  %v842_v46 = vmul.f32 %v1419_v27, %v826_v11  ;;  %1440 = vpow2.f32 %v1089_v5 }
 0x242   : > { %v1423_v16 = vpop.eup %1422  ;;  %857 = vst [vmem:[%s2465_s21 + $0x10] sm:$0xff] %v841_v35  ;;  %v843_v39 = vmul.f32 %v1421_v38, %v827_v9  ;;  %1442 = vpow2.f32 %v1090_v26 }
 0x243   : > { %v1425_v57 = vpop.eup %1424  ;;  %858 = vst [vmem:[%s2465_s21 + $0x18] sm:$0xff] %v842_v46  ;;  %v844_v50 = vmul.f32 %v1423_v16, %v828_v54 }
 0x244   : > { %v1427_v20 = vpop.eup %1426  ;;  %859 = vst [vmem:[%s2465_s21 + $0x20] sm:$0xff] %v843_v39  ;;  %v845_v51 = vmul.f32 %v1425_v57, %v829_v6 }
 0x245   : > { %v1429_v62 = vpop.eup %1428  ;;  %860 = vst [vmem:[%s2465_s21 + $0x28] sm:$0xff] %v844_v50  ;;  %v846_v56 = vmul.f32 %v1427_v20, %v830_v10 }
 0x246   : > { %v1431_v24 = vpop.eup %1430  ;;  %861 = vst [vmem:[%s2465_s21 + $0x30] sm:$0xff] %v845_v51  ;;  %v847_v1 = vmul.f32 %v1429_v62, %v831_v47 }
 0x247   : > { %v1433_v25 = vpop.eup %1432  ;;  %862 = vst [vmem:[%s2465_s21 + $0x38] sm:$0xff] %v846_v56  ;;  %v848_v0 = vmul.f32 %v1431_v24, %v832_v58 }
 0x248   : > { %v1435_v28 = vpop.eup %1434  ;;  %863 = vst [vmem:[%s2465_s21 + $0x40] sm:$0xff] %v847_v1  ;;  %v849_v36 = vmul.f32 %v1433_v25, %v833_v59 }
 0x249   : > { %v1437_v3 = vpop.eup %1436  ;;  %864 = vst [vmem:[%s2465_s21 + $0x48] sm:$0xff] %v848_v0  ;;  %v850_v21 = vmul.f32 %v1435_v28, %v834_v13 }
 0x24a   : > { %v1439_v4 = vpop.eup %1438  ;;  %865 = vst [vmem:[%s2465_s21 + $0x50] sm:$0xff] %v849_v36  ;;  %v851_v29 = vmul.f32 %v1437_v3, %v835_v15 }
 0x24b   : > { %v1441_v37 = vpop.eup %1440  ;;  %866 = vst [vmem:[%s2465_s21 + $0x58] sm:$0xff] %v850_v21  ;;  %v788_v7 = vadd.f32 1.0, %v1439_v4 }
 0x24c   : > { %v1443_v8 = vpop.eup %1442  ;;  %867 = vst [vmem:[%s2465_s21 + $0x60] sm:$0xff] %v851_v29  ;;  %v789_v40 = vadd.f32 1.0, %v1441_v37 }
 0x24d   : > { %1444 = vrcp.f32 %v788_v7  ;;  %v790_v48 = vadd.f32 1.0, %v1443_v8 }
 0x24e   : > { %1446 = vrcp.f32 %v789_v40 }
 0x24f   : > { %1448 = vrcp.f32 %v790_v48 }
 0x257   : > { %v1445_v2 = vpop.eup %1444 }
 0x258   : > { %v1447_v42 = vpop.eup %1446  ;;  %v852_v43 = vmul.f32 %v1445_v2, %v836_v17 }
 0x259   : > { %v1449_v44 = vpop.eup %1448  ;;  %v853_v45 = vmul.f32 %v1447_v42, %v837_v30 }
 0x25a   : > { %868 = vst [vmem:[%s2465_s21 + $0x68] sm:$0xff] %v852_v43  ;;  %v854_v14 = vmul.f32 %v1449_v44, %v838_v31 }
 0x25b   : > { %869 = vst [vmem:[%s2465_s21 + $0x70] sm:$0xff] %v853_v45 }
 0x25c   : > { %870 = vst [vmem:[%s2465_s21 + $0x78] sm:$0xff] %v854_v14 }
 0x25d PF: > { %s1106_s19 = sshll.u32 %s1892_s18, 11  ;;  %s2784_s20 = sld [smem:[#allocation43_spill]] }
 0x25e   : > { %s885_s3 = sshll.u32 %s2465_s21, 4  ;;  %s2609_s13 = scalar_lea.sflag [#allocation6], %s369_s27  ;;  %s2605_s3 = int_to_ptr.vmem [resolvable:$true] %s885_s3 }
 0x25f   : > { %s1580_s29 = scalar_lea.vmem %s2605_s3, 2048  ;;  %p2785_p0 = scmp.ne.s32.totalorder %s2766_s2, 0 }
 0x260   : > { %p1581_p12 = scmp.ne.s32.totalorder %s2605_s3, %s1580_s29  ;;  %s1768_s18 = smov [#allocation12]  }
 0x261   : > { %s1584_s12 = sshll.u32 %s1768_s18, 4  ;;  %s1585_s12 = int_to_ptr.vmem [resolvable:$false] %s1584_s12 }
 0x262   : > { %p1582_p8 = pnand %p1581_p12, %p2785_p0  ;;  %s1586_s22 = scalar_lea.vmem %s1585_s12, 4096 }
 0x263   : > { %s2602_s4 = scalar_lea.hbm %s2784_s20, %s1106_s19  ;;  %p1587_p6 = scmp.lt.s32.totalorder %s2605_s3, %s1585_s12 }
 0x264   : > { %p1583_p2 = pneg %p1582_p8  ;;  %p1588_p10 = scmp.lt.s32.totalorder %s1586_s22, %s1580_s29 }
 0x266   : > { %p1589_p5 = por %p1588_p10, %p1587_p6 }
 0x268   : > { %p1590_p13 = pnand %p1589_p5, %p1583_p2 }
 0x26a   : > { %1593 = shalt.err (!%p1590_p13)
}
 0x26b   : > { %s1594_s25 = scalar_lea.hbm %s2602_s4, 2048  ;;  %s1598_s27 = scalar_lea.hbm %s2784_s20, 8192 }
 0x26c   : > { %p1595_p1 = scmp.ne.s32.totalorder %s2602_s4, %s1594_s25  ;;  %p1599_p4 = scmp.lt.u32.totalorder %s2602_s4, %s2784_s20 }
 0x26d   : > { %p1600_p3 = scmp.lt.u32.totalorder %s1598_s27, %s1594_s25  ;;  %p1602_p12 = scmp.lt.u32.totalorder %s1594_s25, %s2602_s4 }
 0x26e   : > { %p1596_p11 = pnand %p1595_p1, %p2785_p0 }
 0x26f   : > { %p1601_p7 = por %p1600_p3, %p1599_p4 }
 0x270   : > { %p1597_p9 = pneg %p1596_p11 }
 0x271   : > { %p1603_p8 = por %p1602_p12, %p1601_p7 }
 0x273   : > { %p1604_p2 = pnand %p1603_p8, %p1597_p9 }
 0x275   : > { %1607 = shalt.err (!%p1604_p2)
}
 0x276   : > { %s1769_s6 = smov 128   ;;  %s1770_s21 = smov 8  }
 0x277   : > { %1205 = dma.vmem_to_hbm [thread:$0]  (%p2785_p0), %s2605_s3, 2048, %s2602_s4, %s2609_s13, %s1769_s6, %s1769_s6, %s1770_s21  }
 0x278 PF: > { %s2786_s24 = sld [smem:[#allocation27_spill]]  ;;  %p1233_p6 = scmp.ge.s32.totalorder %s1756_s17, 2 }
 0x279   : > { %p2787_p10 = scmp.ne.s32.totalorder %s2769_s5, 0 }
 0x27b   : > { %p1229_p5 = pnand %p1233_p6, %p2787_p10 }
 0x27e   : > { %s900_s19 = sand.u32 1, %s2786_s24  }
 0x27f   : > { %s901_s26 = scalar_lea.sflag [#allocation6], %s900_s19 }
 0x280   : > { %1691 = dma.done.wait (!%p1229_p5), %s901_s26, 2048  }
 0x281   : > { %1693 = vsyncadd (!%p1229_p5), %s901_s26, 4294965248  ;;  %s2788_s11 = sld [smem:[#allocation28_spill]]  ;;  %s2789_s29 = sld [smem:[#allocation29_spill]] }
 0x282   : > { %s2790_s18 = smov %s2173_s28  ;;  %s2791_s6 = sld [smem:[#allocation31_spill]] }
 0x283   : > { %s2792_s2 = sld [smem:[#allocation38_spill]]  ;;  %s2793_s4 = sld [smem:[#allocation32_spill]] }
 0x284   : > { %s2794_s12 = sld [smem:[#allocation33_spill]]  ;;  %s2795_s13 = sld [smem:[#allocation36_spill]] }
 0x285   : > { %s2796_s17 = sld [smem:[#allocation34_spill]]  ;;  %s2797_s16 = sld [smem:[#allocation37_spill]] }
 0x286   : > { %p28_p0 = scmp.ge.s32.totalorder %s2147_s0, 6   ;;  %s2798_s5 = smov %s2147_s0 }
 0x287   : > { %s2799_s28 = smov %s2788_s11  ;;  %s2801_s30 = smov %s2790_s18 }
 0x288   : > { %s2802_s0 = smov %s1716_s7  ;;  %s2803_s7 = smov %s2189_s1 }
 0x289   : > { %s2804_s8 = smov %s1724_s9  ;;  %s2805_s9 = smov %s1728_s10 }
 0x28a   : > { %s2806_s10 = smov %s2792_s2  ;;  %s2807_s11 = smov %s2793_s4 }
 0x28b   : > { %s2808_s14 = smov %s1748_s15  ;;  %s2809_s15 = smov %s2796_s17 }
 0x28c   : > { %s2810_s17 = smov %s2798_s5  ;;  %30 = sbr.rel (!%p28_p0) target bundleno = 28 (0x1c), region = 130 }
 0x293   :  { %906 = vsyncpa [#allocation5], 1 }
 0x294   :  { %908 = vsyncpa [#allocation5 + $0x1], 1 }
 0x295   :  { %909 = vsyncpa [#allocation8], 1 }
 0x296   :  { %911 = vsyncpa [#allocation8 + $0x1], 1 }
 0x297   :  { %912 = vsyncpa [#allocation11], 1 }
 0x298   :  { %914 = vsyncpa [#allocation11 + $0x1], 1 }
 0x299   :  { %915 = vsyncpa [#allocation6], 1 }
 0x29a   :  { %917 = vsyncpa [#allocation6 + $0x1], 1 }

</bundles_post_ra>
